<compile_context>
chip_gen: v7x
topology: tpu7x:2x2x1
jax: 0.10.0
libtpu: 0.0.40
codegen_flags: <defaults>
</compile_context>

<pallas_src>
import numpy as np
import jax
import jax.numpy as jnp
from jax.experimental import pallas as pl
from jax.experimental.pallas import tpu as pltpu

# ---- model config (small, consistent with the module's structure) ----------
NUM_IN = 1          # LSTM input features
NUM_HIDDEN = 32     # num_hidden (== num_hidden_lstm, default -1 -> same)
H = NUM_HIDDEN      # LSTM hidden size
NH = NUM_HIDDEN     # linear1 hidden size
G4 = 4 * H          # 128 = gate width
T = 8               # time steps fed to the LSTM
B = 5               # "seq_len" slot, used as the LSTM batch dimension


def _lstm_mlp_kernel(x_ref, vecs_ref, wbig_ref, out_ref, hseq_ref):
    # ---- unpack the two packed parameter slabs --------------------------------
    vecs = vecs_ref[...]                         # (8, 128)
    wih0 = vecs[0:1, :]                          # (1, 4H) layer-0 input weights (I == 1)
    b0   = vecs[1:2, :]                          # (1, 4H) b_ih_l0 + b_hh_l0
    b1   = vecs[2:3, :]                          # (1, 4H) b_ih_l1 + b_hh_l1
    bl   = vecs[3:4, :]                          # (1, 128) linear1 bias (zero-padded)
    bmv  = vecs[4:5, :]                          # (1, 128) [b_mean, b_var, 0...]

    w_wide = wbig_ref[0:32, :]                   # (H, 8H) = [Whh0 | Wih1]
    whh1   = wbig_ref[32:64, 0:G4]               # (H, 4H)
    wl     = wbig_ref[64:96, 0:G4]               # (H, 128)  linear1 weights (cols >= NH zero)
    wmv    = wbig_ref[64:96, G4:2 * G4]          # (NH, 128) [w_mean | w_var | 0...]

    # ---- hoisted layer-0 input projection for all timesteps (I == 1) ----------
    xproj = x_ref[...] * wih0 + b0               # (T, 4H)

    def act(pre):
        # sigmoid(x) = 0.5*(1 + tanh(x/2)) -> ONE stacked tanh EUP pass yields
        # both the sigmoid and the tanh halves of the gate pre-activation.
        n = pre.shape[0]
        t = jnp.tanh(jnp.concatenate([0.5 * pre, pre], axis=0))
        return 0.5 + 0.5 * t[0:n, :], t[n:2 * n, :]

    def gates(sg, th):                           # PyTorch gate order i, f, g, o
        return sg[:, 0:H], sg[:, H:2 * H], th[:, 2 * H:3 * H], sg[:, 3 * H:4 * H]

    # ---------------- wavefront step 0: layer-0 at t=0 (h0 = c0 = 0) -----------
    sg, th = act(xproj[0:1, :])                  # h0 == 0 -> no recurrent dot
    i, f, g, o = gates(sg, th)
    c0 = i * g
    h0 = o * jnp.tanh(c0)
    zero = jnp.zeros_like(h0)
    hs = jnp.concatenate([h0, zero], axis=0)     # (2, H): row0 = h0(s), row1 = h1(s-1)
    cs = jnp.concatenate([c0, zero], axis=0)     # (2, H): row0 = c0(s), row1 = c1(s-1)

    # --------- wavefront steps s = 1..T-1: layer-0 @ s and layer-1 @ s-1 -------
    for s in range(1, T):                        # fully unrolled (T static)
        # Both dots read only previous-iteration state -> independent, issued
        # back-to-back so they overlap in the MXU pipeline.
        dA = jnp.dot(hs[0:1, :], w_wide, preferred_element_type=jnp.float32)  # (1, 8H)
        dB = jnp.dot(hs[1:2, :], whh1, preferred_element_type=jnp.float32)    # (1, 4H)
        pre0 = xproj[s:s + 1, :] + dA[:, 0:G4]               # layer-0 pre @ time s
        pre1 = dA[:, G4:2 * G4] + dB + b1                    # layer-1 pre @ time s-1
        sg, th = act(jnp.concatenate([pre0, pre1], axis=0))  # one stacked EUP pass
        i, f, g, o = gates(sg, th)
        cs = f * cs + i * g
        hs = o * jnp.tanh(cs)                                # one EUP pass on (2, H)
        hseq_ref[s - 1:s, :] = hs[1:2, :]                    # store h1(s-1)

    # ---------------- wavefront step T: layer-1 at t = T-1 ---------------------
    dA = jnp.dot(hs[0:1, :], w_wide, preferred_element_type=jnp.float32)
    dB = jnp.dot(hs[1:2, :], whh1, preferred_element_type=jnp.float32)
    pre1 = dA[:, G4:2 * G4] + dB + b1
    sg, th = act(pre1)
    i, f, g, o = gates(sg, th)
    c1 = f * cs[1:2, :] + i * g
    h1 = o * jnp.tanh(c1)
    hseq_ref[T - 1:T, :] = h1

    # ---------------- head: linear1 + ReLU, fused mean/var heads ---------------
    hseq = hseq_ref[...]                                               # (T, H)
    z = jnp.dot(hseq, wl, preferred_element_type=jnp.float32) + bl     # (T, 128)
    z = jnp.maximum(z, 0.0)
    # TODO(synk): nn.Dropout(p=0.0) is the identity (eval semantics), so it is omitted.
    out = jnp.dot(z[:, 0:NH], wmv, preferred_element_type=jnp.float32) + bmv  # (T, 128)
    col = jax.lax.broadcasted_iota(jnp.int32, out.shape, 1)
    # tanh on the mean column only; var column stays linear (NoCovariate: no softplus)
    out_ref[...] = jnp.where(col == 0, jnp.tanh(out), out)


def uncertain_lstm_nocovariate(x, c, kernel_params):
    del c  # covariate argument is unused by the NoCovariate forward
    vecs, wbig = kernel_params
    # The forward only consumes lstm_out[:, -1] (last BATCH slot, since the
    # torch LSTM is batch_first=False).  LSTM batch rows are independent, so
    # compute just that row in the kernel.
    x_last = x[:, B - 1, :]                                    # (T, NUM_IN)
    vmem = pl.BlockSpec(memory_space=pltpu.MemorySpace.VMEM)
    out = pl.pallas_call(
        _lstm_mlp_kernel,
        out_shape=jax.ShapeDtypeStruct((T, G4), jnp.float32),  # lane-dense store
        in_specs=[vmem, vmem, vmem],
        out_specs=vmem,
        scratch_shapes=[pltpu.VMEM((T, H), jnp.float32)],      # hseq (layer-1 outputs)
    )(x_last, vecs, wbig)
    return out[:, 0:1], out[:, 1:2]                            # mean, var


# ---- deterministic parameter init (PyTorch-style U(-1/sqrt(fan), 1/sqrt(fan))) ----
def init_params(key):
    ks = jax.random.split(key, 14)
    u = lambda k, shape, b: jax.random.uniform(k, shape, jnp.float32, -b, b)
    kl = 1.0 / np.sqrt(H)

    p = dict(
        w_ih_l0=u(ks[0], (4 * H, NUM_IN), kl),
        w_hh_l0=u(ks[1], (4 * H, H), kl),
        b_ih_l0=u(ks[2], (4 * H,), kl),
        b_hh_l0=u(ks[3], (4 * H,), kl),
        w_ih_l1=u(ks[4], (4 * H, H), kl),
        w_hh_l1=u(ks[5], (4 * H, H), kl),
        b_ih_l1=u(ks[6], (4 * H,), kl),
        b_hh_l1=u(ks[7], (4 * H,), kl),
        w_lin1=u(ks[8], (NH, H), 1.0 / np.sqrt(H)),
        b_lin1=u(ks[9], (NH,), 1.0 / np.sqrt(H)),
        w_mean=u(ks[10], (1, NH), 1.0 / np.sqrt(NH)),
        b_mean=u(ks[11], (1,), 1.0 / np.sqrt(NH)),
        w_var=u(ks[12], (1, NH), 1.0 / np.sqrt(NH)),
        b_var=u(ks[13], (1,), 1.0 / np.sqrt(NH)),
    )

    f32 = jnp.float32
    # --- vector slab (8, 128): one DMA for all (1, *)-class parameters ---------
    bl_pad = jnp.zeros((1, G4), f32).at[0, :NH].set(p["b_lin1"])
    bmv_pad = jnp.zeros((1, G4), f32).at[0, :2].set(
        jnp.concatenate([p["b_mean"], p["b_var"]]))
    vecs = jnp.concatenate([
        p["w_ih_l0"].T,                                        # row 0: (1, 4H)
        (p["b_ih_l0"] + p["b_hh_l0"]).reshape(1, G4),          # row 1
        (p["b_ih_l1"] + p["b_hh_l1"]).reshape(1, G4),          # row 2
        bl_pad,                                                # row 3
        bmv_pad,                                               # row 4
        jnp.zeros((3, G4), f32),                               # rows 5-7 (pad to 8)
    ], axis=0)                                                 # (8, 128)

    # --- matrix slab (96, 256): one DMA for all matmul weights -----------------
    w_wide = jnp.concatenate([p["w_hh_l0"].T, p["w_ih_l1"].T], axis=1)       # (H, 8H)
    whh1_pad = jnp.concatenate([p["w_hh_l1"].T, jnp.zeros((H, G4), f32)], axis=1)
    wl_pad = jnp.zeros((H, G4), f32).at[:, :NH].set(p["w_lin1"].T)
    wmv = jnp.concatenate([p["w_mean"], p["w_var"]], axis=0).T               # (NH, 2)
    wmv_pad = jnp.zeros((NH, G4), f32).at[:, :2].set(wmv)
    head = jnp.concatenate([wl_pad, wmv_pad], axis=1)                        # (H, 8H)
    wbig = jnp.concatenate([w_wide, whh1_pad, head], axis=0)                 # (96, 256)

    return p, (vecs, wbig)


# ---- pure-JAX reference mirroring the PyTorch forward ----------------------
def reference_forward(x, p):
    def lstm_layer(xs, w_ih, w_hh, b_ih, b_hh):
        Tn, Bn, _ = xs.shape
        h = jnp.zeros((Bn, H), jnp.float32)
        c = jnp.zeros((Bn, H), jnp.float32)
        outs = []
        for t in range(Tn):
            pre = xs[t] @ w_ih.T + h @ w_hh.T + b_ih + b_hh
            i, f, g, o = jnp.split(pre, 4, axis=1)
            i, f, o = jax.nn.sigmoid(i), jax.nn.sigmoid(f), jax.nn.sigmoid(o)
            g = jnp.tanh(g)
            c = f * c + i * g
            h = o * jnp.tanh(c)
            outs.append(h)
        return jnp.stack(outs, axis=0)                    # (T, B, H)

    h1_seq = lstm_layer(x, p["w_ih_l0"], p["w_hh_l0"], p["b_ih_l0"], p["b_hh_l0"])
    h2_seq = lstm_layer(h1_seq, p["w_ih_l1"], p["w_hh_l1"], p["b_ih_l1"], p["b_hh_l1"])
    feat = h2_seq[:, -1]                                  # torch x[:, -1] -> (T, H)
    z = jax.nn.relu(feat @ p["w_lin1"].T + p["b_lin1"])
    mean = jnp.tanh(z @ p["w_mean"].T + p["b_mean"])
    var = z @ p["w_var"].T + p["b_var"]
    return mean, var


if __name__ == "__main__":
    key = jax.random.PRNGKey(0)
    kx, kc, kp = jax.random.split(key, 3)
    x = jax.random.normal(kx, (T, B, NUM_IN), jnp.float32)
    c = jax.random.normal(kc, (B, 3), jnp.float32)        # unused covariate
    torch_p, kern_p = init_params(kp)

    mean, var = jax.block_until_ready(uncertain_lstm_nocovariate(x, c, kern_p))

    ref_mean, ref_var = reference_forward(x, torch_p)
    np.testing.assert_allclose(np.asarray(mean), np.asarray(ref_mean),
                               atol=2e-3, rtol=2e-3)
    np.testing.assert_allclose(np.asarray(var), np.asarray(ref_var),
                               atol=2e-3, rtol=2e-3)
    print("KERNEL_OK")
</pallas_src>

<mosaic_0001>
module attributes {stable_mosaic.version = 11 : i64} {
  func.func @_lstm_mlp_kernel(%arg0: memref<8x1xf32, #tpu.memory_space<vmem>>, %arg1: memref<8x128xf32, #tpu.memory_space<vmem>>, %arg2: memref<96x256xf32, #tpu.memory_space<vmem>>, %arg3: memref<8x128xf32, #tpu.memory_space<vmem>>, %arg4: memref<8x32xf32, #tpu.memory_space<vmem>>) attributes {dimension_semantics = [], scalar_prefetch = 0 : i64, scratch_operands = 1 : i64, tpu.core_type = #tpu.core_type<tc>} {
    %c0 = arith.constant 0 : index
    %c0_0 = arith.constant 0 : index
    %0 = vector.load %arg1[%c0, %c0_0] : memref<8x128xf32, #tpu.memory_space<vmem>>, vector<8x128xf32>
    %1 = vector.extract_strided_slice %0 {offsets = [0, 0], sizes = [1, 128], strides = [1, 1]} : vector<8x128xf32> to vector<1x128xf32>
    %2 = vector.extract_strided_slice %0 {offsets = [1, 0], sizes = [1, 128], strides = [1, 1]} : vector<8x128xf32> to vector<1x128xf32>
    %3 = vector.extract_strided_slice %0 {offsets = [2, 0], sizes = [1, 128], strides = [1, 1]} : vector<8x128xf32> to vector<1x128xf32>
    %4 = vector.extract_strided_slice %0 {offsets = [3, 0], sizes = [1, 128], strides = [1, 1]} : vector<8x128xf32> to vector<1x128xf32>
    %5 = vector.extract_strided_slice %0 {offsets = [4, 0], sizes = [1, 128], strides = [1, 1]} : vector<8x128xf32> to vector<1x128xf32>
    %c0_1 = arith.constant 0 : index
    %c0_2 = arith.constant 0 : index
    %6 = vector.load %arg2[%c0_1, %c0_2] : memref<96x256xf32, #tpu.memory_space<vmem>>, vector<32x256xf32>
    %c32 = arith.constant 32 : index
    %c0_3 = arith.constant 0 : index
    %7 = vector.load %arg2[%c32, %c0_3] : memref<96x256xf32, #tpu.memory_space<vmem>>, vector<32x128xf32>
    %c64 = arith.constant 64 : index
    %c0_4 = arith.constant 0 : index
    %8 = vector.load %arg2[%c64, %c0_4] : memref<96x256xf32, #tpu.memory_space<vmem>>, vector<32x128xf32>
    %c64_5 = arith.constant 64 : index
    %c128 = arith.constant 128 : index
    %9 = vector.load %arg2[%c64_5, %c128] : memref<96x256xf32, #tpu.memory_space<vmem>>, vector<32x128xf32>
    %c0_6 = arith.constant 0 : index
    %c0_7 = arith.constant 0 : index
    %10 = vector.load %arg0[%c0_6, %c0_7] : memref<8x1xf32, #tpu.memory_space<vmem>>, vector<8x1xf32>
    %11 = vector.broadcast %10 : vector<8x1xf32> to vector<8x128xf32>
    %12 = vector.broadcast %1 : vector<1x128xf32> to vector<8x128xf32>
    %13 = arith.mulf %11, %12 : vector<8x128xf32>
    %14 = vector.broadcast %2 : vector<1x128xf32> to vector<8x128xf32>
    %15 = arith.addf %13, %14 : vector<8x128xf32>
    %16 = vector.extract_strided_slice %15 {offsets = [0, 0], sizes = [1, 128], strides = [1, 1]} : vector<8x128xf32> to vector<1x128xf32>
    %cst = arith.constant 5.000000e-01 : f32
    %17 = vector.broadcast %cst : f32 to vector<1x128xf32>
    %18 = arith.mulf %17, %16 : vector<1x128xf32>
    %19 = tpu.concatenate %18, %16 in 0 : vector<1x128xf32>, vector<1x128xf32> -> vector<2x128xf32>
    %20 = math.tanh %19 : vector<2x128xf32>
    %21 = vector.extract_strided_slice %20 {offsets = [0, 0], sizes = [1, 128], strides = [1, 1]} : vector<2x128xf32> to vector<1x128xf32>
    %cst_8 = arith.constant 5.000000e-01 : f32
    %22 = vector.broadcast %cst_8 : f32 to vector<1x128xf32>
    %23 = arith.mulf %22, %21 : vector<1x128xf32>
    %cst_9 = arith.constant 5.000000e-01 : f32
    %24 = vector.broadcast %cst_9 : f32 to vector<1x128xf32>
    %25 = arith.addf %24, %23 : vector<1x128xf32>
    %26 = vector.extract_strided_slice %20 {offsets = [1, 0], sizes = [1, 128], strides = [1, 1]} : vector<2x128xf32> to vector<1x128xf32>
    %27 = vector.extract_strided_slice %25 {offsets = [0, 0], sizes = [1, 32], strides = [1, 1]} : vector<1x128xf32> to vector<1x32xf32>
    %28 = vector.extract_strided_slice %26 {offsets = [0, 64], sizes = [1, 32], strides = [1, 1]} : vector<1x128xf32> to vector<1x32xf32>
    %29 = vector.extract_strided_slice %25 {offsets = [0, 96], sizes = [1, 32], strides = [1, 1]} : vector<1x128xf32> to vector<1x32xf32>
    %30 = arith.mulf %27, %28 : vector<1x32xf32>
    %31 = math.tanh %30 : vector<1x32xf32>
    %32 = arith.mulf %29, %31 : vector<1x32xf32>
    %cst_10 = arith.constant 0.000000e+00 : f32
    %33 = vector.broadcast %cst_10 : f32 to vector<1x32xf32>
    %34 = tpu.concatenate %32, %33 in 0 : vector<1x32xf32>, vector<1x32xf32> -> vector<2x32xf32>
    %35 = tpu.concatenate %30, %33 in 0 : vector<1x32xf32>, vector<1x32xf32> -> vector<2x32xf32>
    %36 = vector.extract_strided_slice %34 {offsets = [0, 0], sizes = [1, 32], strides = [1, 1]} : vector<2x32xf32> to vector<1x32xf32>
    %cst_11 = arith.constant dense<0.000000e+00> : vector<1x256xf32>
    %37 = tpu.matmul %36, %6, %cst_11 {dimension_numbers = #tpu.dot_dimension_numbers<[1], [0], [0], [1], [0, 0, 1, 1], [], []>} : vector<1x32xf32>, vector<32x256xf32>, vector<1x256xf32> -> vector<1x256xf32>
    %38 = vector.extract_strided_slice %34 {offsets = [1, 0], sizes = [1, 32], strides = [1, 1]} : vector<2x32xf32> to vector<1x32xf32>
    %cst_12 = arith.constant dense<0.000000e+00> : vector<1x128xf32>
    %39 = tpu.matmul %38, %7, %cst_12 {dimension_numbers = #tpu.dot_dimension_numbers<[1], [0], [0], [1], [0, 0, 1, 1], [], []>} : vector<1x32xf32>, vector<32x128xf32>, vector<1x128xf32> -> vector<1x128xf32>
    %40 = vector.extract_strided_slice %15 {offsets = [1, 0], sizes = [1, 128], strides = [1, 1]} : vector<8x128xf32> to vector<1x128xf32>
    %41 = vector.extract_strided_slice %37 {offsets = [0, 0], sizes = [1, 128], strides = [1, 1]} : vector<1x256xf32> to vector<1x128xf32>
    %42 = arith.addf %40, %41 : vector<1x128xf32>
    %43 = vector.extract_strided_slice %37 {offsets = [0, 128], sizes = [1, 128], strides = [1, 1]} : vector<1x256xf32> to vector<1x128xf32>
    %44 = arith.addf %43, %39 : vector<1x128xf32>
    %45 = arith.addf %44, %3 : vector<1x128xf32>
    %46 = tpu.concatenate %42, %45 in 0 : vector<1x128xf32>, vector<1x128xf32> -> vector<2x128xf32>
    %cst_13 = arith.constant 5.000000e-01 : f32
    %47 = vector.broadcast %cst_13 : f32 to vector<2x128xf32>
    %48 = arith.mulf %47, %46 : vector<2x128xf32>
    %49 = tpu.concatenate %48, %46 in 0 : vector<2x128xf32>, vector<2x128xf32> -> vector<4x128xf32>
    %50 = math.tanh %49 : vector<4x128xf32>
    %51 = vector.extract_strided_slice %50 {offsets = [0, 0], sizes = [2, 128], strides = [1, 1]} : vector<4x128xf32> to vector<2x128xf32>
    %cst_14 = arith.constant 5.000000e-01 : f32
    %52 = vector.broadcast %cst_14 : f32 to vector<2x128xf32>
    %53 = arith.mulf %52, %51 : vector<2x128xf32>
    %cst_15 = arith.constant 5.000000e-01 : f32
    %54 = vector.broadcast %cst_15 : f32 to vector<2x128xf32>
    %55 = arith.addf %54, %53 : vector<2x128xf32>
    %56 = vector.extract_strided_slice %50 {offsets = [2, 0], sizes = [2, 128], strides = [1, 1]} : vector<4x128xf32> to vector<2x128xf32>
    %57 = vector.extract_strided_slice %55 {offsets = [0, 0], sizes = [2, 32], strides = [1, 1]} : vector<2x128xf32> to vector<2x32xf32>
    %58 = vector.extract_strided_slice %55 {offsets = [0, 32], sizes = [2, 32], strides = [1, 1]} : vector<2x128xf32> to vector<2x32xf32>
    %59 = vector.extract_strided_slice %56 {offsets = [0, 64], sizes = [2, 32], strides = [1, 1]} : vector<2x128xf32> to vector<2x32xf32>
    %60 = vector.extract_strided_slice %55 {offsets = [0, 96], sizes = [2, 32], strides = [1, 1]} : vector<2x128xf32> to vector<2x32xf32>
    %61 = arith.mulf %58, %35 : vector<2x32xf32>
    %62 = arith.mulf %57, %59 : vector<2x32xf32>
    %63 = arith.addf %61, %62 : vector<2x32xf32>
    %64 = math.tanh %63 : vector<2x32xf32>
    %65 = arith.mulf %60, %64 : vector<2x32xf32>
    %66 = vector.extract_strided_slice %65 {offsets = [1, 0], sizes = [1, 32], strides = [1, 1]} : vector<2x32xf32> to vector<1x32xf32>
    %c0_16 = arith.constant 0 : index
    %c0_17 = arith.constant 0 : index
    %67 = vector.load %arg4[%c0_16, %c0_17] : memref<8x32xf32, #tpu.memory_space<vmem>>, vector<1x32xf32>
    tpu.vector_store %arg4[%c0_16, %c0_17], %66 {strides = array<i32>} : memref<8x32xf32, #tpu.memory_space<vmem>>, vector<1x32xf32>,
    %68 = vector.extract_strided_slice %65 {offsets = [0, 0], sizes = [1, 32], strides = [1, 1]} : vector<2x32xf32> to vector<1x32xf32>
    %cst_18 = arith.constant dense<0.000000e+00> : vector<1x256xf32>
    %69 = tpu.matmul %68, %6, %cst_18 {dimension_numbers = #tpu.dot_dimension_numbers<[1], [0], [0], [1], [0, 0, 1, 1], [], []>} : vector<1x32xf32>, vector<32x256xf32>, vector<1x256xf32> -> vector<1x256xf32>
    %70 = vector.extract_strided_slice %65 {offsets = [1, 0], sizes = [1, 32], strides = [1, 1]} : vector<2x32xf32> to vector<1x32xf32>
    %cst_19 = arith.constant dense<0.000000e+00> : vector<1x128xf32>
    %71 = tpu.matmul %70, %7, %cst_19 {dimension_numbers = #tpu.dot_dimension_numbers<[1], [0], [0], [1], [0, 0, 1, 1], [], []>} : vector<1x32xf32>, vector<32x128xf32>, vector<1x128xf32> -> vector<1x128xf32>
    %72 = vector.extract_strided_slice %15 {offsets = [2, 0], sizes = [1, 128], strides = [1, 1]} : vector<8x128xf32> to vector<1x128xf32>
    %73 = vector.extract_strided_slice %69 {offsets = [0, 0], sizes = [1, 128], strides = [1, 1]} : vector<1x256xf32> to vector<1x128xf32>
    %74 = arith.addf %72, %73 : vector<1x128xf32>
    %75 = vector.extract_strided_slice %69 {offsets = [0, 128], sizes = [1, 128], strides = [1, 1]} : vector<1x256xf32> to vector<1x128xf32>
    %76 = arith.addf %75, %71 : vector<1x128xf32>
    %77 = arith.addf %76, %3 : vector<1x128xf32>
    %78 = tpu.concatenate %74, %77 in 0 : vector<1x128xf32>, vector<1x128xf32> -> vector<2x128xf32>
    %cst_20 = arith.constant 5.000000e-01 : f32
    %79 = vector.broadcast %cst_20 : f32 to vector<2x128xf32>
    %80 = arith.mulf %79, %78 : vector<2x128xf32>
    %81 = tpu.concatenate %80, %78 in 0 : vector<2x128xf32>, vector<2x128xf32> -> vector<4x128xf32>
    %82 = math.tanh %81 : vector<4x128xf32>
    %83 = vector.extract_strided_slice %82 {offsets = [0, 0], sizes = [2, 128], strides = [1, 1]} : vector<4x128xf32> to vector<2x128xf32>
    %cst_21 = arith.constant 5.000000e-01 : f32
    %84 = vector.broadcast %cst_21 : f32 to vector<2x128xf32>
    %85 = arith.mulf %84, %83 : vector<2x128xf32>
    %cst_22 = arith.constant 5.000000e-01 : f32
    %86 = vector.broadcast %cst_22 : f32 to vector<2x128xf32>
    %87 = arith.addf %86, %85 : vector<2x128xf32>
    %88 = vector.extract_strided_slice %82 {offsets = [2, 0], sizes = [2, 128], strides = [1, 1]} : vector<4x128xf32> to vector<2x128xf32>
    %89 = vector.extract_strided_slice %87 {offsets = [0, 0], sizes = [2, 32], strides = [1, 1]} : vector<2x128xf32> to vector<2x32xf32>
    %90 = vector.extract_strided_slice %87 {offsets = [0, 32], sizes = [2, 32], strides = [1, 1]} : vector<2x128xf32> to vector<2x32xf32>
    %91 = vector.extract_strided_slice %88 {offsets = [0, 64], sizes = [2, 32], strides = [1, 1]} : vector<2x128xf32> to vector<2x32xf32>
    %92 = vector.extract_strided_slice %87 {offsets = [0, 96], sizes = [2, 32], strides = [1, 1]} : vector<2x128xf32> to vector<2x32xf32>
    %93 = arith.mulf %90, %63 : vector<2x32xf32>
    %94 = arith.mulf %89, %91 : vector<2x32xf32>
    %95 = arith.addf %93, %94 : vector<2x32xf32>
    %96 = math.tanh %95 : vector<2x32xf32>
    %97 = arith.mulf %92, %96 : vector<2x32xf32>
    %98 = vector.extract_strided_slice %97 {offsets = [1, 0], sizes = [1, 32], strides = [1, 1]} : vector<2x32xf32> to vector<1x32xf32>
    %c1 = arith.constant 1 : index
    %c0_23 = arith.constant 0 : index
    %99 = vector.load %arg4[%c1, %c0_23] : memref<8x32xf32, #tpu.memory_space<vmem>>, vector<1x32xf32>
    tpu.vector_store %arg4[%c1, %c0_23], %98 {strides = array<i32>} : memref<8x32xf32, #tpu.memory_space<vmem>>, vector<1x32xf32>,
    %100 = vector.extract_strided_slice %97 {offsets = [0, 0], sizes = [1, 32], strides = [1, 1]} : vector<2x32xf32> to vector<1x32xf32>
    %cst_24 = arith.constant dense<0.000000e+00> : vector<1x256xf32>
    %101 = tpu.matmul %100, %6, %cst_24 {dimension_numbers = #tpu.dot_dimension_numbers<[1], [0], [0], [1], [0, 0, 1, 1], [], []>} : vector<1x32xf32>, vector<32x256xf32>, vector<1x256xf32> -> vector<1x256xf32>
    %102 = vector.extract_strided_slice %97 {offsets = [1, 0], sizes = [1, 32], strides = [1, 1]} : vector<2x32xf32> to vector<1x32xf32>
    %cst_25 = arith.constant dense<0.000000e+00> : vector<1x128xf32>
    %103 = tpu.matmul %102, %7, %cst_25 {dimension_numbers = #tpu.dot_dimension_numbers<[1], [0], [0], [1], [0, 0, 1, 1], [], []>} : vector<1x32xf32>, vector<32x128xf32>, vector<1x128xf32> -> vector<1x128xf32>
    %104 = vector.extract_strided_slice %15 {offsets = [3, 0], sizes = [1, 128], strides = [1, 1]} : vector<8x128xf32> to vector<1x128xf32>
    %105 = vector.extract_strided_slice %101 {offsets = [0, 0], sizes = [1, 128], strides = [1, 1]} : vector<1x256xf32> to vector<1x128xf32>
    %106 = arith.addf %104, %105 : vector<1x128xf32>
    %107 = vector.extract_strided_slice %101 {offsets = [0, 128], sizes = [1, 128], strides = [1, 1]} : vector<1x256xf32> to vector<1x128xf32>
    %108 = arith.addf %107, %103 : vector<1x128xf32>
    %109 = arith.addf %108, %3 : vector<1x128xf32>
    %110 = tpu.concatenate %106, %109 in 0 : vector<1x128xf32>, vector<1x128xf32> -> vector<2x128xf32>
    %cst_26 = arith.constant 5.000000e-01 : f32
    %111 = vector.broadcast %cst_26 : f32 to vector<2x128xf32>
    %112 = arith.mulf %111, %110 : vector<2x128xf32>
    %113 = tpu.concatenate %112, %110 in 0 : vector<2x128xf32>, vector<2x128xf32> -> vector<4x128xf32>
    %114 = math.tanh %113 : vector<4x128xf32>
    %115 = vector.extract_strided_slice %114 {offsets = [0, 0], sizes = [2, 128], strides = [1, 1]} : vector<4x128xf32> to vector<2x128xf32>
    %cst_27 = arith.constant 5.000000e-01 : f32
    %116 = vector.broadcast %cst_27 : f32 to vector<2x128xf32>
    %117 = arith.mulf %116, %115 : vector<2x128xf32>
    %cst_28 = arith.constant 5.000000e-01 : f32
    %118 = vector.broadcast %cst_28 : f32 to vector<2x128xf32>
    %119 = arith.addf %118, %117 : vector<2x128xf32>
    %120 = vector.extract_strided_slice %114 {offsets = [2, 0], sizes = [2, 128], strides = [1, 1]} : vector<4x128xf32> to vector<2x128xf32>
    %121 = vector.extract_strided_slice %119 {offsets = [0, 0], sizes = [2, 32], strides = [1, 1]} : vector<2x128xf32> to vector<2x32xf32>
    %122 = vector.extract_strided_slice %119 {offsets = [0, 32], sizes = [2, 32], strides = [1, 1]} : vector<2x128xf32> to vector<2x32xf32>
    %123 = vector.extract_strided_slice %120 {offsets = [0, 64], sizes = [2, 32], strides = [1, 1]} : vector<2x128xf32> to vector<2x32xf32>
    %124 = vector.extract_strided_slice %119 {offsets = [0, 96], sizes = [2, 32], strides = [1, 1]} : vector<2x128xf32> to vector<2x32xf32>
    %125 = arith.mulf %122, %95 : vector<2x32xf32>
    %126 = arith.mulf %121, %123 : vector<2x32xf32>
    %127 = arith.addf %125, %126 : vector<2x32xf32>
    %128 = math.tanh %127 : vector<2x32xf32>
    %129 = arith.mulf %124, %128 : vector<2x32xf32>
    %130 = vector.extract_strided_slice %129 {offsets = [1, 0], sizes = [1, 32], strides = [1, 1]} : vector<2x32xf32> to vector<1x32xf32>
    %c2 = arith.constant 2 : index
    %c0_29 = arith.constant 0 : index
    %131 = vector.load %arg4[%c2, %c0_29] : memref<8x32xf32, #tpu.memory_space<vmem>>, vector<1x32xf32>
    tpu.vector_store %arg4[%c2, %c0_29], %130 {strides = array<i32>} : memref<8x32xf32, #tpu.memory_space<vmem>>, vector<1x32xf32>,
    %132 = vector.extract_strided_slice %129 {offsets = [0, 0], sizes = [1, 32], strides = [1, 1]} : vector<2x32xf32> to vector<1x32xf32>
    %cst_30 = arith.constant dense<0.000000e+00> : vector<1x256xf32>
    %133 = tpu.matmul %132, %6, %cst_30 {dimension_numbers = #tpu.dot_dimension_numbers<[1], [0], [0], [1], [0, 0, 1, 1], [], []>} : vector<1x32xf32>, vector<32x256xf32>, vector<1x256xf32> -> vector<1x256xf32>
    %134 = vector.extract_strided_slice %129 {offsets = [1, 0], sizes = [1, 32], strides = [1, 1]} : vector<2x32xf32> to vector<1x32xf32>
    %cst_31 = arith.constant dense<0.000000e+00> : vector<1x128xf32>
    %135 = tpu.matmul %134, %7, %cst_31 {dimension_numbers = #tpu.dot_dimension_numbers<[1], [0], [0], [1], [0, 0, 1, 1], [], []>} : vector<1x32xf32>, vector<32x128xf32>, vector<1x128xf32> -> vector<1x128xf32>
    %136 = vector.extract_strided_slice %15 {offsets = [4, 0], sizes = [1, 128], strides = [1, 1]} : vector<8x128xf32> to vector<1x128xf32>
    %137 = vector.extract_strided_slice %133 {offsets = [0, 0], sizes = [1, 128], strides = [1, 1]} : vector<1x256xf32> to vector<1x128xf32>
    %138 = arith.addf %136, %137 : vector<1x128xf32>
    %139 = vector.extract_strided_slice %133 {offsets = [0, 128], sizes = [1, 128], strides = [1, 1]} : vector<1x256xf32> to vector<1x128xf32>
    %140 = arith.addf %139, %135 : vector<1x128xf32>
    %141 = arith.addf %140, %3 : vector<1x128xf32>
    %142 = tpu.concatenate %138, %141 in 0 : vector<1x128xf32>, vector<1x128xf32> -> vector<2x128xf32>
    %cst_32 = arith.constant 5.000000e-01 : f32
    %143 = vector.broadcast %cst_32 : f32 to vector<2x128xf32>
    %144 = arith.mulf %143, %142 : vector<2x128xf32>
    %145 = tpu.concatenate %144, %142 in 0 : vector<2x128xf32>, vector<2x128xf32> -> vector<4x128xf32>
    %146 = math.tanh %145 : vector<4x128xf32>
    %147 = vector.extract_strided_slice %146 {offsets = [0, 0], sizes = [2, 128], strides = [1, 1]} : vector<4x128xf32> to vector<2x128xf32>
    %cst_33 = arith.constant 5.000000e-01 : f32
    %148 = vector.broadcast %cst_33 : f32 to vector<2x128xf32>
    %149 = arith.mulf %148, %147 : vector<2x128xf32>
    %cst_34 = arith.constant 5.000000e-01 : f32
    %150 = vector.broadcast %cst_34 : f32 to vector<2x128xf32>
    %151 = arith.addf %150, %149 : vector<2x128xf32>
    %152 = vector.extract_strided_slice %146 {offsets = [2, 0], sizes = [2, 128], strides = [1, 1]} : vector<4x128xf32> to vector<2x128xf32>
    %153 = vector.extract_strided_slice %151 {offsets = [0, 0], sizes = [2, 32], strides = [1, 1]} : vector<2x128xf32> to vector<2x32xf32>
    %154 = vector.extract_strided_slice %151 {offsets = [0, 32], sizes = [2, 32], strides = [1, 1]} : vector<2x128xf32> to vector<2x32xf32>
    %155 = vector.extract_strided_slice %152 {offsets = [0, 64], sizes = [2, 32], strides = [1, 1]} : vector<2x128xf32> to vector<2x32xf32>
    %156 = vector.extract_strided_slice %151 {offsets = [0, 96], sizes = [2, 32], strides = [1, 1]} : vector<2x128xf32> to vector<2x32xf32>
    %157 = arith.mulf %154, %127 : vector<2x32xf32>
    %158 = arith.mulf %153, %155 : vector<2x32xf32>
    %159 = arith.addf %157, %158 : vector<2x32xf32>
    %160 = math.tanh %159 : vector<2x32xf32>
    %161 = arith.mulf %156, %160 : vector<2x32xf32>
    %162 = vector.extract_strided_slice %161 {offsets = [1, 0], sizes = [1, 32], strides = [1, 1]} : vector<2x32xf32> to vector<1x32xf32>
    %c3 = arith.constant 3 : index
    %c0_35 = arith.constant 0 : index
    %163 = vector.load %arg4[%c3, %c0_35] : memref<8x32xf32, #tpu.memory_space<vmem>>, vector<1x32xf32>
    tpu.vector_store %arg4[%c3, %c0_35], %162 {strides = array<i32>} : memref<8x32xf32, #tpu.memory_space<vmem>>, vector<1x32xf32>,
    %164 = vector.extract_strided_slice %161 {offsets = [0, 0], sizes = [1, 32], strides = [1, 1]} : vector<2x32xf32> to vector<1x32xf32>
    %cst_36 = arith.constant dense<0.000000e+00> : vector<1x256xf32>
    %165 = tpu.matmul %164, %6, %cst_36 {dimension_numbers = #tpu.dot_dimension_numbers<[1], [0], [0], [1], [0, 0, 1, 1], [], []>} : vector<1x32xf32>, vector<32x256xf32>, vector<1x256xf32> -> vector<1x256xf32>
    %166 = vector.extract_strided_slice %161 {offsets = [1, 0], sizes = [1, 32], strides = [1, 1]} : vector<2x32xf32> to vector<1x32xf32>
    %cst_37 = arith.constant dense<0.000000e+00> : vector<1x128xf32>
    %167 = tpu.matmul %166, %7, %cst_37 {dimension_numbers = #tpu.dot_dimension_numbers<[1], [0], [0], [1], [0, 0, 1, 1], [], []>} : vector<1x32xf32>, vector<32x128xf32>, vector<1x128xf32> -> vector<1x128xf32>
    %168 = vector.extract_strided_slice %15 {offsets = [5, 0], sizes = [1, 128], strides = [1, 1]} : vector<8x128xf32> to vector<1x128xf32>
    %169 = vector.extract_strided_slice %165 {offsets = [0, 0], sizes = [1, 128], strides = [1, 1]} : vector<1x256xf32> to vector<1x128xf32>
    %170 = arith.addf %168, %169 : vector<1x128xf32>
    %171 = vector.extract_strided_slice %165 {offsets = [0, 128], sizes = [1, 128], strides = [1, 1]} : vector<1x256xf32> to vector<1x128xf32>
    %172 = arith.addf %171, %167 : vector<1x128xf32>
    %173 = arith.addf %172, %3 : vector<1x128xf32>
    %174 = tpu.concatenate %170, %173 in 0 : vector<1x128xf32>, vector<1x128xf32> -> vector<2x128xf32>
    %cst_38 = arith.constant 5.000000e-01 : f32
    %175 = vector.broadcast %cst_38 : f32 to vector<2x128xf32>
    %176 = arith.mulf %175, %174 : vector<2x128xf32>
    %177 = tpu.concatenate %176, %174 in 0 : vector<2x128xf32>, vector<2x128xf32> -> vector<4x128xf32>
    %178 = math.tanh %177 : vector<4x128xf32>
    %179 = vector.extract_strided_slice %178 {offsets = [0, 0], sizes = [2, 128], strides = [1, 1]} : vector<4x128xf32> to vector<2x128xf32>
    %cst_39 = arith.constant 5.000000e-01 : f32
    %180 = vector.broadcast %cst_39 : f32 to vector<2x128xf32>
    %181 = arith.mulf %180, %179 : vector<2x128xf32>
    %cst_40 = arith.constant 5.000000e-01 : f32
    %182 = vector.broadcast %cst_40 : f32 to vector<2x128xf32>
    %183 = arith.addf %182, %181 : vector<2x128xf32>
    %184 = vector.extract_strided_slice %178 {offsets = [2, 0], sizes = [2, 128], strides = [1, 1]} : vector<4x128xf32> to vector<2x128xf32>
    %185 = vector.extract_strided_slice %183 {offsets = [0, 0], sizes = [2, 32], strides = [1, 1]} : vector<2x128xf32> to vector<2x32xf32>
    %186 = vector.extract_strided_slice %183 {offsets = [0, 32], sizes = [2, 32], strides = [1, 1]} : vector<2x128xf32> to vector<2x32xf32>
    %187 = vector.extract_strided_slice %184 {offsets = [0, 64], sizes = [2, 32], strides = [1, 1]} : vector<2x128xf32> to vector<2x32xf32>
    %188 = vector.extract_strided_slice %183 {offsets = [0, 96], sizes = [2, 32], strides = [1, 1]} : vector<2x128xf32> to vector<2x32xf32>
    %189 = arith.mulf %186, %159 : vector<2x32xf32>
    %190 = arith.mulf %185, %187 : vector<2x32xf32>
    %191 = arith.addf %189, %190 : vector<2x32xf32>
    %192 = math.tanh %191 : vector<2x32xf32>
    %193 = arith.mulf %188, %192 : vector<2x32xf32>
    %194 = vector.extract_strided_slice %193 {offsets = [1, 0], sizes = [1, 32], strides = [1, 1]} : vector<2x32xf32> to vector<1x32xf32>
    %c4 = arith.constant 4 : index
    %c0_41 = arith.constant 0 : index
    %195 = vector.load %arg4[%c4, %c0_41] : memref<8x32xf32, #tpu.memory_space<vmem>>, vector<1x32xf32>
    tpu.vector_store %arg4[%c4, %c0_41], %194 {strides = array<i32>} : memref<8x32xf32, #tpu.memory_space<vmem>>, vector<1x32xf32>,
    %196 = vector.extract_strided_slice %193 {offsets = [0, 0], sizes = [1, 32], strides = [1, 1]} : vector<2x32xf32> to vector<1x32xf32>
    %cst_42 = arith.constant dense<0.000000e+00> : vector<1x256xf32>
    %197 = tpu.matmul %196, %6, %cst_42 {dimension_numbers = #tpu.dot_dimension_numbers<[1], [0], [0], [1], [0, 0, 1, 1], [], []>} : vector<1x32xf32>, vector<32x256xf32>, vector<1x256xf32> -> vector<1x256xf32>
    %198 = vector.extract_strided_slice %193 {offsets = [1, 0], sizes = [1, 32], strides = [1, 1]} : vector<2x32xf32> to vector<1x32xf32>
    %cst_43 = arith.constant dense<0.000000e+00> : vector<1x128xf32>
    %199 = tpu.matmul %198, %7, %cst_43 {dimension_numbers = #tpu.dot_dimension_numbers<[1], [0], [0], [1], [0, 0, 1, 1], [], []>} : vector<1x32xf32>, vector<32x128xf32>, vector<1x128xf32> -> vector<1x128xf32>
    %200 = vector.extract_strided_slice %15 {offsets = [6, 0], sizes = [1, 128], strides = [1, 1]} : vector<8x128xf32> to vector<1x128xf32>
    %201 = vector.extract_strided_slice %197 {offsets = [0, 0], sizes = [1, 128], strides = [1, 1]} : vector<1x256xf32> to vector<1x128xf32>
    %202 = arith.addf %200, %201 : vector<1x128xf32>
    %203 = vector.extract_strided_slice %197 {offsets = [0, 128], sizes = [1, 128], strides = [1, 1]} : vector<1x256xf32> to vector<1x128xf32>
    %204 = arith.addf %203, %199 : vector<1x128xf32>
    %205 = arith.addf %204, %3 : vector<1x128xf32>
    %206 = tpu.concatenate %202, %205 in 0 : vector<1x128xf32>, vector<1x128xf32> -> vector<2x128xf32>
    %cst_44 = arith.constant 5.000000e-01 : f32
    %207 = vector.broadcast %cst_44 : f32 to vector<2x128xf32>
    %208 = arith.mulf %207, %206 : vector<2x128xf32>
    %209 = tpu.concatenate %208, %206 in 0 : vector<2x128xf32>, vector<2x128xf32> -> vector<4x128xf32>
    %210 = math.tanh %209 : vector<4x128xf32>
    %211 = vector.extract_strided_slice %210 {offsets = [0, 0], sizes = [2, 128], strides = [1, 1]} : vector<4x128xf32> to vector<2x128xf32>
    %cst_45 = arith.constant 5.000000e-01 : f32
    %212 = vector.broadcast %cst_45 : f32 to vector<2x128xf32>
    %213 = arith.mulf %212, %211 : vector<2x128xf32>
    %cst_46 = arith.constant 5.000000e-01 : f32
    %214 = vector.broadcast %cst_46 : f32 to vector<2x128xf32>
    %215 = arith.addf %214, %213 : vector<2x128xf32>
    %216 = vector.extract_strided_slice %210 {offsets = [2, 0], sizes = [2, 128], strides = [1, 1]} : vector<4x128xf32> to vector<2x128xf32>
    %217 = vector.extract_strided_slice %215 {offsets = [0, 0], sizes = [2, 32], strides = [1, 1]} : vector<2x128xf32> to vector<2x32xf32>
    %218 = vector.extract_strided_slice %215 {offsets = [0, 32], sizes = [2, 32], strides = [1, 1]} : vector<2x128xf32> to vector<2x32xf32>
    %219 = vector.extract_strided_slice %216 {offsets = [0, 64], sizes = [2, 32], strides = [1, 1]} : vector<2x128xf32> to vector<2x32xf32>
    %220 = vector.extract_strided_slice %215 {offsets = [0, 96], sizes = [2, 32], strides = [1, 1]} : vector<2x128xf32> to vector<2x32xf32>
    %221 = arith.mulf %218, %191 : vector<2x32xf32>
    %222 = arith.mulf %217, %219 : vector<2x32xf32>
    %223 = arith.addf %221, %222 : vector<2x32xf32>
    %224 = math.tanh %223 : vector<2x32xf32>
    %225 = arith.mulf %220, %224 : vector<2x32xf32>
    %226 = vector.extract_strided_slice %225 {offsets = [1, 0], sizes = [1, 32], strides = [1, 1]} : vector<2x32xf32> to vector<1x32xf32>
    %c5 = arith.constant 5 : index
    %c0_47 = arith.constant 0 : index
    %227 = vector.load %arg4[%c5, %c0_47] : memref<8x32xf32, #tpu.memory_space<vmem>>, vector<1x32xf32>
    tpu.vector_store %arg4[%c5, %c0_47], %226 {strides = array<i32>} : memref<8x32xf32, #tpu.memory_space<vmem>>, vector<1x32xf32>,
    %228 = vector.extract_strided_slice %225 {offsets = [0, 0], sizes = [1, 32], strides = [1, 1]} : vector<2x32xf32> to vector<1x32xf32>
    %cst_48 = arith.constant dense<0.000000e+00> : vector<1x256xf32>
    %229 = tpu.matmul %228, %6, %cst_48 {dimension_numbers = #tpu.dot_dimension_numbers<[1], [0], [0], [1], [0, 0, 1, 1], [], []>} : vector<1x32xf32>, vector<32x256xf32>, vector<1x256xf32> -> vector<1x256xf32>
    %230 = vector.extract_strided_slice %225 {offsets = [1, 0], sizes = [1, 32], strides = [1, 1]} : vector<2x32xf32> to vector<1x32xf32>
    %cst_49 = arith.constant dense<0.000000e+00> : vector<1x128xf32>
    %231 = tpu.matmul %230, %7, %cst_49 {dimension_numbers = #tpu.dot_dimension_numbers<[1], [0], [0], [1], [0, 0, 1, 1], [], []>} : vector<1x32xf32>, vector<32x128xf32>, vector<1x128xf32> -> vector<1x128xf32>
    %232 = vector.extract_strided_slice %15 {offsets = [7, 0], sizes = [1, 128], strides = [1, 1]} : vector<8x128xf32> to vector<1x128xf32>
    %233 = vector.extract_strided_slice %229 {offsets = [0, 0], sizes = [1, 128], strides = [1, 1]} : vector<1x256xf32> to vector<1x128xf32>
    %234 = arith.addf %232, %233 : vector<1x128xf32>
    %235 = vector.extract_strided_slice %229 {offsets = [0, 128], sizes = [1, 128], strides = [1, 1]} : vector<1x256xf32> to vector<1x128xf32>
    %236 = arith.addf %235, %231 : vector<1x128xf32>
    %237 = arith.addf %236, %3 : vector<1x128xf32>
    %238 = tpu.concatenate %234, %237 in 0 : vector<1x128xf32>, vector<1x128xf32> -> vector<2x128xf32>
    %cst_50 = arith.constant 5.000000e-01 : f32
    %239 = vector.broadcast %cst_50 : f32 to vector<2x128xf32>
    %240 = arith.mulf %239, %238 : vector<2x128xf32>
    %241 = tpu.concatenate %240, %238 in 0 : vector<2x128xf32>, vector<2x128xf32> -> vector<4x128xf32>
    %242 = math.tanh %241 : vector<4x128xf32>
    %243 = vector.extract_strided_slice %242 {offsets = [0, 0], sizes = [2, 128], strides = [1, 1]} : vector<4x128xf32> to vector<2x128xf32>
    %cst_51 = arith.constant 5.000000e-01 : f32
    %244 = vector.broadcast %cst_51 : f32 to vector<2x128xf32>
    %245 = arith.mulf %244, %243 : vector<2x128xf32>
    %cst_52 = arith.constant 5.000000e-01 : f32
    %246 = vector.broadcast %cst_52 : f32 to vector<2x128xf32>
    %247 = arith.addf %246, %245 : vector<2x128xf32>
    %248 = vector.extract_strided_slice %242 {offsets = [2, 0], sizes = [2, 128], strides = [1, 1]} : vector<4x128xf32> to vector<2x128xf32>
    %249 = vector.extract_strided_slice %247 {offsets = [0, 0], sizes = [2, 32], strides = [1, 1]} : vector<2x128xf32> to vector<2x32xf32>
    %250 = vector.extract_strided_slice %247 {offsets = [0, 32], sizes = [2, 32], strides = [1, 1]} : vector<2x128xf32> to vector<2x32xf32>
    %251 = vector.extract_strided_slice %248 {offsets = [0, 64], sizes = [2, 32], strides = [1, 1]} : vector<2x128xf32> to vector<2x32xf32>
    %252 = vector.extract_strided_slice %247 {offsets = [0, 96], sizes = [2, 32], strides = [1, 1]} : vector<2x128xf32> to vector<2x32xf32>
    %253 = arith.mulf %250, %223 : vector<2x32xf32>
    %254 = arith.mulf %249, %251 : vector<2x32xf32>
    %255 = arith.addf %253, %254 : vector<2x32xf32>
    %256 = math.tanh %255 : vector<2x32xf32>
    %257 = arith.mulf %252, %256 : vector<2x32xf32>
    %258 = vector.extract_strided_slice %257 {offsets = [1, 0], sizes = [1, 32], strides = [1, 1]} : vector<2x32xf32> to vector<1x32xf32>
    %c6 = arith.constant 6 : index
    %c0_53 = arith.constant 0 : index
    %259 = vector.load %arg4[%c6, %c0_53] : memref<8x32xf32, #tpu.memory_space<vmem>>, vector<1x32xf32>
    tpu.vector_store %arg4[%c6, %c0_53], %258 {strides = array<i32>} : memref<8x32xf32, #tpu.memory_space<vmem>>, vector<1x32xf32>,
    %260 = vector.extract_strided_slice %257 {offsets = [0, 0], sizes = [1, 32], strides = [1, 1]} : vector<2x32xf32> to vector<1x32xf32>
    %cst_54 = arith.constant dense<0.000000e+00> : vector<1x256xf32>
    %261 = tpu.matmul %260, %6, %cst_54 {dimension_numbers = #tpu.dot_dimension_numbers<[1], [0], [0], [1], [0, 0, 1, 1], [], []>} : vector<1x32xf32>, vector<32x256xf32>, vector<1x256xf32> -> vector<1x256xf32>
    %262 = vector.extract_strided_slice %257 {offsets = [1, 0], sizes = [1, 32], strides = [1, 1]} : vector<2x32xf32> to vector<1x32xf32>
    %cst_55 = arith.constant dense<0.000000e+00> : vector<1x128xf32>
    %263 = tpu.matmul %262, %7, %cst_55 {dimension_numbers = #tpu.dot_dimension_numbers<[1], [0], [0], [1], [0, 0, 1, 1], [], []>} : vector<1x32xf32>, vector<32x128xf32>, vector<1x128xf32> -> vector<1x128xf32>
    %264 = vector.extract_strided_slice %261 {offsets = [0, 128], sizes = [1, 128], strides = [1, 1]} : vector<1x256xf32> to vector<1x128xf32>
    %265 = arith.addf %264, %263 : vector<1x128xf32>
    %266 = arith.addf %265, %3 : vector<1x128xf32>
    %cst_56 = arith.constant 5.000000e-01 : f32
    %267 = vector.broadcast %cst_56 : f32 to vector<1x128xf32>
    %268 = arith.mulf %267, %266 : vector<1x128xf32>
    %269 = tpu.concatenate %268, %266 in 0 : vector<1x128xf32>, vector<1x128xf32> -> vector<2x128xf32>
    %270 = math.tanh %269 : vector<2x128xf32>
    %271 = vector.extract_strided_slice %270 {offsets = [0, 0], sizes = [1, 128], strides = [1, 1]} : vector<2x128xf32> to vector<1x128xf32>
    %cst_57 = arith.constant 5.000000e-01 : f32
    %272 = vector.broadcast %cst_57 : f32 to vector<1x128xf32>
    %273 = arith.mulf %272, %271 : vector<1x128xf32>
    %cst_58 = arith.constant 5.000000e-01 : f32
    %274 = vector.broadcast %cst_58 : f32 to vector<1x128xf32>
    %275 = arith.addf %274, %273 : vector<1x128xf32>
    %276 = vector.extract_strided_slice %270 {offsets = [1, 0], sizes = [1, 128], strides = [1, 1]} : vector<2x128xf32> to vector<1x128xf32>
    %277 = vector.extract_strided_slice %275 {offsets = [0, 0], sizes = [1, 32], strides = [1, 1]} : vector<1x128xf32> to vector<1x32xf32>
    %278 = vector.extract_strided_slice %275 {offsets = [0, 32], sizes = [1, 32], strides = [1, 1]} : vector<1x128xf32> to vector<1x32xf32>
    %279 = vector.extract_strided_slice %276 {offsets = [0, 64], sizes = [1, 32], strides = [1, 1]} : vector<1x128xf32> to vector<1x32xf32>
    %280 = vector.extract_strided_slice %275 {offsets = [0, 96], sizes = [1, 32], strides = [1, 1]} : vector<1x128xf32> to vector<1x32xf32>
    %281 = vector.extract_strided_slice %255 {offsets = [1, 0], sizes = [1, 32], strides = [1, 1]} : vector<2x32xf32> to vector<1x32xf32>
    %282 = arith.mulf %278, %281 : vector<1x32xf32>
    %283 = arith.mulf %277, %279 : vector<1x32xf32>
    %284 = arith.addf %282, %283 : vector<1x32xf32>
    %285 = math.tanh %284 : vector<1x32xf32>
    %286 = arith.mulf %280, %285 : vector<1x32xf32>
    %c7 = arith.constant 7 : index
    %c0_59 = arith.constant 0 : index
    %287 = vector.load %arg4[%c7, %c0_59] : memref<8x32xf32, #tpu.memory_space<vmem>>, vector<1x32xf32>
    tpu.vector_store %arg4[%c7, %c0_59], %286 {strides = array<i32>} : memref<8x32xf32, #tpu.memory_space<vmem>>, vector<1x32xf32>,
    %c0_60 = arith.constant 0 : index
    %c0_61 = arith.constant 0 : index
    %288 = vector.load %arg4[%c0_60, %c0_61] : memref<8x32xf32, #tpu.memory_space<vmem>>, vector<8x32xf32>
    %cst_62 = arith.constant dense<0.000000e+00> : vector<8x128xf32>
    %289 = tpu.matmul %288, %8, %cst_62 {dimension_numbers = #tpu.dot_dimension_numbers<[1], [0], [0], [1], [0, 0, 1, 1], [], []>} : vector<8x32xf32>, vector<32x128xf32>, vector<8x128xf32> -> vector<8x128xf32>
    %290 = vector.broadcast %4 : vector<1x128xf32> to vector<8x128xf32>
    %291 = arith.addf %289, %290 : vector<8x128xf32>
    %cst_63 = arith.constant 0.000000e+00 : f32
    %292 = vector.broadcast %cst_63 : f32 to vector<8x128xf32>
    %293 = arith.maximumf %291, %292 : vector<8x128xf32>
    %294 = vector.extract_strided_slice %293 {offsets = [0, 0], sizes = [8, 32], strides = [1, 1]} : vector<8x128xf32> to vector<8x32xf32>
    %cst_64 = arith.constant dense<0.000000e+00> : vector<8x128xf32>
    %295 = tpu.matmul %294, %9, %cst_64 {dimension_numbers = #tpu.dot_dimension_numbers<[1], [0], [0], [1], [0, 0, 1, 1], [], []>} : vector<8x32xf32>, vector<32x128xf32>, vector<8x128xf32> -> vector<8x128xf32>
    %296 = vector.broadcast %5 : vector<1x128xf32> to vector<8x128xf32>
    %297 = arith.addf %295, %296 : vector<8x128xf32>
    %298 = tpu.iota {dimensions = array<i32: 1>} : vector<8x128xi32>
    %c0_i32 = arith.constant 0 : i32
    %299 = vector.broadcast %c0_i32 : i32 to vector<8x128xi32>
    %300 = arith.cmpi eq, %298, %299 : vector<8x128xi32>
    %301 = math.tanh %297 : vector<8x128xf32>
    %302 = arith.select %300, %301, %297 : vector<8x128xi1>, vector<8x128xf32>
    %c0_65 = arith.constant 0 : index
    %c0_66 = arith.constant 0 : index
    %303 = vector.load %arg3[%c0_65, %c0_66] : memref<8x128xf32, #tpu.memory_space<vmem>>, vector<8x128xf32>
    tpu.vector_store %arg3[%c0_65, %c0_66], %302 {strides = array<i32>} : memref<8x128xf32, #tpu.memory_space<vmem>>, vector<8x128xf32>,
    return
  }
}

</mosaic_0001>

<bundles_post_ra>
// kernel: tpu_custom_call.1
= control target key start
LH: loop header
LB: loop body
LE: loop exit
PB: predicated region body
PF: predicated region fallthrough
CT: control target
= control target key end

     0   :  { %8 = vsyncpa [#allocation4], 0  ;;  %s2498_s0 = inlined_call_operand.vmem [shape: f32[8,1], index: 0, kind: input, shape index: {}]   ;;  %s2499_s1 = inlined_call_operand.vmem [shape: f32[8,128], index: 1, kind: input, shape index: {}]   ;;  %s2500_s2 = inlined_call_operand.hbm [shape: f32[96,256], index: 2, kind: input, shape index: {}]   ;;  %s2501_s3 = inlined_call_operand.hbm [shape: f32[8,128], index: 3, kind: output, shape index: {}]  }
   0x1   :  { %9 = vsyncpa [#allocation5], 0  ;;  %s2207_s12 = smov [#allocation3]   ;;  %s2159_s16 = scalar_lea.hbm %s2500_s2, 3072 }
   0x2   :  { %s19_s13 = sshll.u32 %s2207_s12, 4  ;;  %p2160_p0 = scmp.ne.s32.totalorder %s2500_s2, %s2159_s16  ;;  %s20_s13 = int_to_ptr.vmem [resolvable:$true] %s19_s13 }
   0x3   :  { %p2163_p1 = scmp.lt.u32.totalorder %s2159_s16, %s2500_s2 }
   0x5   :  { %p2165_p2 = pnand %p2163_p1, %p2160_p0 }
   0x7   :  { %2168 = shalt.err (!%p2165_p2)
}
   0x8   :  { %s2169_s21 = scalar_lea.vmem %s20_s13, 3072  ;;  %p2174_p4 = scmp.lt.s32.totalorder %s20_s13, %s20_s13 }
   0x9   :  { %p2170_p3 = scmp.ne.s32.totalorder %s20_s13, %s2169_s21  ;;  %p2175_p5 = scmp.lt.s32.totalorder %s2169_s21, %s2169_s21 }
   0xb   :  { %p2176_p6 = por %p2175_p5, %p2174_p4 }
   0xd   :  { %p2177_p7 = pnand %p2176_p6, %p2170_p3 }
   0xf   :  { %2180 = shalt.err (!%p2177_p7)
}
  0x10   :  { %s2208_s22 = smov 256   ;;  %s2209_s23 = smov 16  }
  0x11   :  { %25 = dma.hbm_to_vmem [thread:$0]  %s2500_s2, 3072, %s20_s13, [#allocation4], %s2208_s22, %s2208_s22, %s2209_s23  }
  0x12   :  { %2203 = dma.done.wait [#allocation4], 3072  }
  0x13   :  { %2204 = vsyncadd [#allocation4], 4294964224  ;;  %v2210_v0 = vmov 0   ;;  %v50_v1 = vld [vmem:[%s2498_s0] sm:$0xff]  ;;  %v56_v2 = vlaneseq  ;;  %vm70_vm0 = vcmask 1040384   ;;  %s2211_s0 = smov 64  }
  0x14   :  { %2120 = vset.pattern.permute.xlu0 %v2210_v0  ;;  %v2260_v5 = vld [vmem:[%s2499_s1] sm:$0xff]  ;;  %v33_v22 = vld [vmem:[#allocation3 + $0x18] sm:$0xff]  ;;  %v30_v23 = vld [vmem:[#allocation3] sm:$0xff]  ;;  %v2212_v26 = vmov 0.0|0.0   ;;  %v2213_v29 = vmov 0.0   ;;  %s2214_s1 = smov 96  }
  0x15   :  { %53 = vperm.xlu0 %2120, %v50_v1   ;;  %v2254_v3 = vshrl.u32 %v56_v2, 7  ;;  %v31_v21 = vld [vmem:[#allocation3 + $0x8] sm:$0xff]  ;;  %v32_v25 = vld [vmem:[#allocation3 + $0x10] sm:$0xff]  ;;  %1993 = vmatprep.subr.bf16.mxu1 %v2212_v26  ;;  %v38_v27 = vld [vmem:[#allocation3 + $0x40] sm:$0xff]  ;;  %vm2215_vm1 = vmmov 0   ;;  %s2216_s2 = smov 32  }
  0x16   :  { %v2271_v24 = vpack.c.bf16 %v33_v22, %v31_v21  ;;  %v39_v28 = vld [vmem:[#allocation3 + $0x50] sm:$0xff]  ;;  %159 = vmatprep.mubr.f32.mxu0 %v2213_v29  ;;  %v2275_v30 = vpack.c.bf16 %v32_v25, %v30_v23  ;;  %v35_v32 = vld [vmem:[#allocation3 + $0x28] sm:$0xff]  ;;  %v37_v33 = vld [vmem:[#allocation3 + $0x38] sm:$0xff]  ;;  %1883 = vmatprep.mubr.msk.f32.mxu1 %vm2215_vm1, %v2213_v29  ;;  %vm92_vm2 = vcmask 261120   ;;  %v2315_v50 = vrot.slane %v2260_v5, 2  ;;  %s2217_s30 = smov [#allocation6]  }
  0x17   :  { %v58_v4 = vsub.s32 0, %v2254_v3  ;;  %v63_v6 = vsub.s32 1, %v2254_v3  ;;  %v2277_v31 = vpack.c.bf16 %v39_v28, %v38_v27  ;;  %v34_v34 = vld [vmem:[#allocation3 + $0x20] sm:$0xff]  ;;  %v2280_v36 = vpack.c.bf16 %v37_v33, %v35_v32  ;;  %v36_v37 = vld [vmem:[#allocation3 + $0x30] sm:$0xff]  ;;  %s1798_s4 = sshll.u32 %s2217_s30, 4  ;;  %s1799_s4 = int_to_ptr.vmem [resolvable:$true] %s1798_s4 }
  0x18   :  { %1986 = vmatprep.subr.bf16.mxu0 %v2271_v24  ;;  %v40_v38 = vld [vmem:[#allocation3 + $0x60] sm:$0xff]  ;;  %v41_v39 = vld [vmem:[#allocation3 + $0x70] sm:$0xff]  ;;  %v2283_v40 = vpack.c.bf16 %v36_v37, %v34_v34  ;;  %vm261_vm3 = vcmask 1041408   ;;  %vm292_vm4 = vcmask 254977   ;;  %vm1628_vm5 = vcmask 253952   ;;  %s2181_s5 = scalar_lea.vmem %s1799_s4, 128  ;;  %p2186_p9 = scmp.lt.s32.totalorder %s1799_s4, %s1799_s4 }
  0x19   :  { %v59_v7 = vrot.slane %v2260_v5, %v58_v4  ;;  %v64_v8 = vrot.slane %v2260_v5, %v63_v6  ;;  %1988 = vmatpush1.bf16.msra.mxu0 %v2275_v30  ;;  %1995 = vmatpush3.bf16.msra.mxu1 %v2277_v31  ;;  %v2287_v41 = vpack.c.bf16 %v41_v39, %v40_v38  ;;  %p2182_p8 = scmp.ne.s32.totalorder %s1799_s4, %s2181_s5  ;;  %p2187_p10 = scmp.lt.s32.totalorder %s2181_s5, %s2181_s5 }
  0x1a   :  { %1990 = vmatprep.subr.bf16.mxu0 %v2280_v36  ;;  %1996 = vmatprep.subr.bf16.mxu1 %v2212_v26 }
  0x1b   :  { %p2188_p11 = por %p2187_p10, %p2186_p9 }
  0x1d   :  { %1992 = vmatpush1.bf16.msra.mxu0 %v2283_v40  ;;  %1998 = vmatpush3.bf16.msra.mxu1 %v2287_v41  ;;  %p2189_p12 = pnand %p2188_p11, %p2182_p8 }
  0x1e   :  { %2000 = vmatprep.subr.bf16.mxu0 %v2271_v24  ;;  %2007 = vmatprep.subr.bf16.mxu1 %v2212_v26 }
  0x94   :  { %v54_v9 = vpop.permute.xlu0 %53 }
  0x95   :  { %v60_v10 = vmul.f32 %v59_v7, %v54_v9 }
  0x97   :  { %v2265_v11 = vadd.f32 %v64_v8, %v60_v10 }
  0x99   :  { %v66_v12 = vmul.f32 0.5, %v2265_v11  ;;  %v68_v13 = vrot.slane %v2265_v11, 7 }
  0x9b   :  { %v71_v14 = vsel %vm70_vm0, %v66_v12, %v68_v13 }
  0x9c   :  { %2121 = vtanh.f32 %v71_v14 }
  0xa6   :  { %v2122_v15 = vpop.eup %2121 }
  0xa7   :  { %v76_v16 = vrot.slane %v2122_v15, 1  ;;  %v73_v17 = vmul.f32 0.5, %v2122_v15 }
  0xa9   :  { %77 = vrot.lane.b32.xlu0 %v76_v16, %s2211_s0  ;;  %v74_v18 = vadd.f32 0.5, %v73_v17 }
 0x11b   :  { %v78_v19 = vpop.permute.xlu0 %77 }
 0x11c   :  { %v80_v20 = vmul.f32 %v78_v19, %v74_v18 }
 0x11e   :  { %2123 = vtanh.f32 %v80_v20  ;;  %v88_v46 = vsel %vm70_vm0, %v80_v20, 0.0 }
 0x128   :  { %v2124_v35 = vpop.eup %2123 }
 0x129   :  { %83 = vrot.lane.b32.xlu1 %v2124_v35, %s2214_s1 }
 0x19b   :  { %v84_v42 = vpop.permute.xlu1 %83 }
 0x19c   :  { %v86_v43 = vmul.f32 %v84_v42, %v74_v18 }
 0x19e   :  { %v87_v44 = vsel %vm70_vm0, %v86_v43, 0.0 }
 0x19f   :  { %90 = vrot.lane.b32.xlu1 %v87_v44, %s2216_s2  ;;  %v166_v45 = vrot.slane %v87_v44, 1 }
 0x1a1   :  { %167 = vrot.lane.b32.xlu0 %v166_v45, %s2216_s2 }
 0x1a5   :  { %267 = vrot.lane.b32.xlu0 %v88_v46, %s2216_s2 }
 0x211   :  { %v91_v47 = vpop.permute.xlu1 %90 }
 0x212   :  { %1807 = vmatmul.mubr.msk.f32.vlgmr.msra.gmra.mrb[0].mxu0 %vm92_vm2, %v91_v47 }
 0x213   :  { %v168_v48 = vpop.permute.xlu0 %167  ;;  %2002 = vmatpush1.bf16.msra.mxu0 %v2275_v30  ;;  %360 = vmatprep.mubr.f32.mxu0 %v2213_v29 }
 0x214   :  { %1884 = vmatmul.mubr.msk.f32.vlgmr.msra.gmra.mrb[0].mxu1 %vm92_vm2, %v168_v48  ;;  %2004 = vmatprep.subr.bf16.mxu0 %v2280_v36 }
 0x215   :  { %2009 = vmatpush3.bf16.msra.mxu1 %v2277_v31  ;;  %1894 = vmatprep.mubr.msk.f32.mxu1 %vm2215_vm1, %v2213_v29 }
 0x216   :  { %2010 = vmatprep.subr.bf16.mxu1 %v2212_v26 }
 0x217   :  { %2006 = vmatpush1.bf16.msra.mxu0 %v2283_v40  ;;  %v268_v9 = vpop.permute.xlu0 %267 }
 0x218   :  { %2014 = vmatprep.subr.bf16.mxu0 %v2271_v24 }
 0x219   :  { %2012 = vmatpush3.bf16.msra.mxu1 %v2287_v41 }
 0x21a   :  { %2021 = vmatprep.subr.bf16.mxu1 %v2212_v26 }
 0x2e5   :  { %v161_v49 = vpop.f32.mrb[0].mxu0 }
 0x2e6   :  { %v242_v51 = vrot.slane %v161_v49, 7  ;;  %v163_v52 = vpop.f32.mrb[1].mxu0 }
 0x2e7   :  { %v237_v53 = vpop.f32.mrb[0].mxu1 }
 0x2e8   :  { %v244_v54 = vadd.f32 %v242_v51, %v2265_v11  ;;  %v245_v55 = vadd.f32 %v237_v53, %v163_v52  ;;  %v1885_v56 = vpop.f32.mrb[1].mxu1 }
 0x2ea   :  { %v249_v57 = vadd.f32 %v2315_v50, %v245_v55  ;;  %v251_v58 = vrot.slane %v244_v54, 1 }
 0x2ec   :  { %v254_v59 = vrot.slane %v249_v57, 7 }
 0x2ee   :  { %v256_v60 = vsel %vm70_vm0, %v251_v58, %v254_v59 }
 0x2ef   :  { %v257_v61 = vmul.f32 0.5, %v256_v60  ;;  %v259_v62 = vrot.slane %v256_v60, 6 }
 0x2f1   :  { %v262_v63 = vsel %vm261_vm3, %v257_v61, %v259_v62 }
 0x2f2   :  { %2125 = vtanh.f32 %v262_v63 }
 0x2fc   :  { %v2126_v0 = vpop.eup %2125 }
 0x2fd   :  { %v272_v1 = vrot.slane %v2126_v0, 2  ;;  %v264_v4 = vmul.f32 0.5, %v2126_v0 }
 0x2ff   :  { %273 = vrot.lane.b32.xlu1 %v272_v1, %s2211_s0  ;;  %v265_v6 = vadd.f32 0.5, %v264_v4 }
 0x301   :  { %v270_v10 = vmul.f32 %v268_v9, %v265_v6 }
 0x371   :  { %v274_v7 = vpop.permute.xlu1 %273 }
 0x372   :  { %v276_v8 = vmul.f32 %v274_v7, %v265_v6 }
 0x374   :  { %278 = vrot.lane.b32.xlu1 %v276_v8, %s2216_s2 }
 0x3e6   :  { %v279_v12 = vpop.permute.xlu1 %278 }
 0x3e7   :  { %v281_v13 = vadd.f32 %v279_v12, %v270_v10 }
 0x3e9   :  { %2127 = vtanh.f32 %v281_v13 }
 0x3f3   :  { %v2128_v14 = vpop.eup %2127 }
 0x3f4   :  { %284 = vrot.lane.b32.xlu0 %v2128_v14, %s2211_s0 }
 0x466   :  { %v285_v15 = vpop.permute.xlu0 %284 }
 0x467   :  { %v287_v16 = vmul.f32 %v285_v15, %v265_v6 }
 0x469   :  { %v367_v17 = vrot.slane %v287_v16, 1  ;;  %289 = vrot.lane.b32.xlu1 %v287_v16, %s2216_s2 }
 0x46b   :  { %368 = vrot.lane.b32.xlu0 %v367_v17, %s2216_s2 }
 0x4db   :  { %v290_v18 = vpop.permute.xlu1 %289 }
 0x4dc   :  { %293 = vst.msk [vmem:[#allocation2 - $0x1] sm:$0x2] %vm292_vm4, %v290_v18  ;;  %1809 = vmatmul.mubr.msk.f32.vlgmr.msra.gmra.mrb[2].mxu0 %vm92_vm2, %v290_v18 }
 0x4dd   :  { %v369_v19 = vpop.permute.xlu0 %368  ;;  %2016 = vmatpush1.bf16.msra.mxu0 %v2275_v30  ;;  %552 = vmatprep.mubr.f32.mxu0 %v2213_v29 }
 0x4de   :  { %1895 = vmatmul.mubr.msk.f32.vlgmr.msra.gmra.mrb[2].mxu1 %vm92_vm2, %v369_v19  ;;  %2018 = vmatprep.subr.bf16.mxu0 %v2280_v36 }
 0x4df   :  { %2023 = vmatpush3.bf16.msra.mxu1 %v2277_v31  ;;  %1905 = vmatprep.mubr.msk.f32.mxu1 %vm2215_vm1, %v2213_v29 }
 0x4e0   :  { %2024 = vmatprep.subr.bf16.mxu1 %v2212_v26 }
 0x4e1   :  { %2020 = vmatpush1.bf16.msra.mxu0 %v2283_v40 }
 0x4e2   :  { %2028 = vmatprep.subr.bf16.mxu0 %v2271_v24 }
 0x4e3   :  { %2026 = vmatpush3.bf16.msra.mxu1 %v2287_v41 }
 0x4e4   :  { %2035 = vmatprep.subr.bf16.mxu1 %v2212_v26 }
 0x5af   :  { %v362_v20 = vpop.f32.mrb[2].mxu0 }
 0x5b0   :  { %v443_v21 = vrot.slane %v362_v20, 6  ;;  %v364_v22 = vpop.f32.mrb[3].mxu0 }
 0x5b1   :  { %v438_v23 = vpop.f32.mrb[2].mxu1 }
 0x5b2   :  { %v445_v25 = vadd.f32 %v443_v21, %v2265_v11  ;;  %v446_v27 = vadd.f32 %v438_v23, %v364_v22  ;;  %v1896_v28 = vpop.f32.mrb[3].mxu1 }
 0x5b4   :  { %v447_v32 = vadd.f32 %v446_v27, %v2315_v50  ;;  %v449_v33 = vrot.slane %v445_v25, 2 }
 0x5b6   :  { %v452_v34 = vrot.slane %v447_v32, 7 }
 0x5b8   :  { %v454_v35 = vsel %vm70_vm0, %v449_v33, %v452_v34 }
 0x5b9   :  { %v455_v37 = vmul.f32 0.5, %v454_v35  ;;  %v457_v38 = vrot.slane %v454_v35, 6 }
 0x5bb   :  { %v459_v39 = vsel %vm261_vm3, %v455_v37, %v457_v38 }
 0x5bc   :  { %2129 = vtanh.f32 %v459_v39 }
 0x5c6   :  { %v2130_v42 = vpop.eup %2129 }
 0x5c7   :  { %v465_v43 = vrot.slane %v2130_v42, 2  ;;  %v461_v44 = vmul.f32 0.5, %v2130_v42 }
 0x5c9   :  { %466 = vrot.lane.b32.xlu1 %v465_v43, %s2211_s0  ;;  %v462_v45 = vadd.f32 0.5, %v461_v44 }
 0x5cb   :  { %v463_v48 = vmul.f32 %v462_v45, %v281_v13 }
 0x63b   :  { %v467_v46 = vpop.permute.xlu1 %466 }
 0x63c   :  { %v469_v47 = vmul.f32 %v467_v46, %v462_v45 }
 0x63e   :  { %471 = vrot.lane.b32.xlu0 %v469_v47, %s2216_s2 }
 0x6b0   :  { %v472_v49 = vpop.permute.xlu0 %471 }
 0x6b1   :  { %v474_v51 = vadd.f32 %v472_v49, %v463_v48 }
 0x6b3   :  { %2131 = vtanh.f32 %v474_v51 }
 0x6bd   :  { %v2132_v52 = vpop.eup %2131 }
 0x6be   :  { %477 = vrot.lane.b32.xlu1 %v2132_v52, %s2211_s0 }
 0x730   :  { %v478_v53 = vpop.permute.xlu1 %477 }
 0x731   :  { %v480_v54 = vmul.f32 %v478_v53, %v462_v45 }
 0x733   :  { %v559_v55 = vrot.slane %v480_v54, 1  ;;  %482 = vrot.lane.b32.xlu0 %v480_v54, %s2216_s2 }
 0x735   :  { %560 = vrot.lane.b32.xlu1 %v559_v55, %s2216_s2 }
 0x7a5   :  { %v483_v56 = vpop.permute.xlu0 %482 }
 0x7a6   :  { %485 = vst.msk [vmem:[#allocation2] sm:$0x2] %vm292_vm4, %v483_v56  ;;  %1811 = vmatmul.mubr.msk.f32.vlgmr.msra.gmra.mrb[4].mxu0 %vm92_vm2, %v483_v56 }
 0x7a7   :  { %v561_v57 = vpop.permute.xlu1 %560  ;;  %2030 = vmatpush1.bf16.msra.mxu0 %v2275_v30  ;;  %744 = vmatprep.mubr.f32.mxu0 %v2213_v29 }
 0x7a8   :  { %1906 = vmatmul.mubr.msk.f32.vlgmr.msra.gmra.mrb[4].mxu1 %vm92_vm2, %v561_v57  ;;  %2032 = vmatprep.subr.bf16.mxu0 %v2280_v36 }
 0x7a9   :  { %2037 = vmatpush3.bf16.msra.mxu1 %v2277_v31  ;;  %1916 = vmatprep.mubr.msk.f32.mxu1 %vm2215_vm1, %v2213_v29 }
 0x7aa   :  { %2038 = vmatprep.subr.bf16.mxu1 %v2212_v26 }
 0x7ab   :  { %2034 = vmatpush1.bf16.msra.mxu0 %v2283_v40 }
 0x7ac   :  { %2042 = vmatprep.subr.bf16.mxu0 %v2271_v24 }
 0x7ad   :  { %2040 = vmatpush3.bf16.msra.mxu1 %v2287_v41 }
 0x7ae   :  { %2049 = vmatprep.subr.bf16.mxu1 %v2212_v26 }
 0x879   :  { %v554_v58 = vpop.f32.mrb[4].mxu0 }
 0x87a   :  { %v635_v59 = vrot.slane %v554_v58, 5  ;;  %v556_v60 = vpop.f32.mrb[5].mxu0 }
 0x87b   :  { %v630_v61 = vpop.f32.mrb[4].mxu1 }
 0x87c   :  { %v637_v62 = vadd.f32 %v635_v59, %v2265_v11  ;;  %v638_v63 = vadd.f32 %v630_v61, %v556_v60  ;;  %v1907_v0 = vpop.f32.mrb[5].mxu1 }
 0x87e   :  { %v639_v1 = vadd.f32 %v638_v63, %v2315_v50  ;;  %v641_v4 = vrot.slane %v637_v62, 3 }
 0x880   :  { %v644_v6 = vrot.slane %v639_v1, 7 }
 0x882   :  { %v646_v7 = vsel %vm70_vm0, %v641_v4, %v644_v6 }
 0x883   :  { %v647_v8 = vmul.f32 0.5, %v646_v7  ;;  %v649_v9 = vrot.slane %v646_v7, 6 }
 0x885   :  { %v651_v10 = vsel %vm261_vm3, %v647_v8, %v649_v9 }
 0x886   :  { %2133 = vtanh.f32 %v651_v10 }
 0x890   :  { %v2134_v12 = vpop.eup %2133 }
 0x891   :  { %v657_v13 = vrot.slane %v2134_v12, 2  ;;  %v653_v14 = vmul.f32 0.5, %v2134_v12 }
 0x893   :  { %658 = vrot.lane.b32.xlu0 %v657_v13, %s2211_s0  ;;  %v654_v15 = vadd.f32 0.5, %v653_v14 }
 0x895   :  { %v655_v18 = vmul.f32 %v654_v15, %v474_v51 }
 0x905   :  { %v659_v16 = vpop.permute.xlu0 %658 }
 0x906   :  { %v661_v17 = vmul.f32 %v659_v16, %v654_v15 }
 0x908   :  { %663 = vrot.lane.b32.xlu1 %v661_v17, %s2216_s2 }
 0x97a   :  { %v664_v19 = vpop.permute.xlu1 %663 }
 0x97b   :  { %v666_v20 = vadd.f32 %v664_v19, %v655_v18 }
 0x97d   :  { %2135 = vtanh.f32 %v666_v20 }
 0x987   :  { %v2136_v21 = vpop.eup %2135 }
 0x988   :  { %669 = vrot.lane.b32.xlu0 %v2136_v21, %s2211_s0 }
 0x9fa   :  { %v670_v22 = vpop.permute.xlu0 %669 }
 0x9fb   :  { %v672_v23 = vmul.f32 %v670_v22, %v654_v15 }
 0x9fd   :  { %v751_v25 = vrot.slane %v672_v23, 1  ;;  %674 = vrot.lane.b32.xlu1 %v672_v23, %s2216_s2 }
 0x9ff   :  { %752 = vrot.lane.b32.xlu0 %v751_v25, %s2216_s2 }
 0xa6f   :  { %v675_v27 = vpop.permute.xlu1 %674 }
 0xa70   :  { %677 = vst.msk [vmem:[#allocation2 + $0x1] sm:$0x2] %vm292_vm4, %v675_v27  ;;  %1813 = vmatmul.mubr.msk.f32.vlgmr.msra.gmra.mrb[6].mxu0 %vm92_vm2, %v675_v27 }
 0xa71   :  { %v753_v28 = vpop.permute.xlu0 %752  ;;  %2044 = vmatpush1.bf16.msra.mxu0 %v2275_v30  ;;  %936 = vmatprep.mubr.f32.mxu0 %v2213_v29 }
 0xa72   :  { %1917 = vmatmul.mubr.msk.f32.vlgmr.msra.gmra.mrb[6].mxu1 %vm92_vm2, %v753_v28  ;;  %2046 = vmatprep.subr.bf16.mxu0 %v2280_v36 }
 0xa73   :  { %2051 = vmatpush3.bf16.msra.mxu1 %v2277_v31  ;;  %1927 = vmatprep.mubr.msk.f32.mxu1 %vm2215_vm1, %v2213_v29 }
 0xa74   :  { %2052 = vmatprep.subr.bf16.mxu1 %v2212_v26 }
 0xa75   :  { %2048 = vmatpush1.bf16.msra.mxu0 %v2283_v40 }
 0xa76   :  { %2056 = vmatprep.subr.bf16.mxu0 %v2271_v24 }
 0xa77   :  { %2054 = vmatpush3.bf16.msra.mxu1 %v2287_v41 }
 0xa78   :  { %2063 = vmatprep.subr.bf16.mxu1 %v2212_v26 }
 0xb43   :  { %v746_v32 = vpop.f32.mrb[6].mxu0 }
 0xb44   :  { %v827_v33 = vrot.slane %v746_v32, 4  ;;  %v748_v34 = vpop.f32.mrb[7].mxu0 }
 0xb45   :  { %v822_v35 = vpop.f32.mrb[6].mxu1 }
 0xb46   :  { %v829_v37 = vadd.f32 %v827_v33, %v2265_v11  ;;  %v830_v38 = vadd.f32 %v822_v35, %v748_v34  ;;  %v1918_v39 = vpop.f32.mrb[7].mxu1 }
 0xb48   :  { %v831_v42 = vadd.f32 %v830_v38, %v2315_v50  ;;  %v833_v43 = vrot.slane %v829_v37, 4 }
 0xb4a   :  { %v836_v44 = vrot.slane %v831_v42, 7 }
 0xb4c   :  { %v838_v45 = vsel %vm70_vm0, %v833_v43, %v836_v44 }
 0xb4d   :  { %v839_v46 = vmul.f32 0.5, %v838_v45  ;;  %v841_v47 = vrot.slane %v838_v45, 6 }
 0xb4f   :  { %v843_v48 = vsel %vm261_vm3, %v839_v46, %v841_v47 }
 0xb50   :  { %2137 = vtanh.f32 %v843_v48 }
 0xb5a   :  { %v2138_v49 = vpop.eup %2137 }
 0xb5b   :  { %v849_v51 = vrot.slane %v2138_v49, 2  ;;  %v845_v52 = vmul.f32 0.5, %v2138_v49 }
 0xb5d   :  { %850 = vrot.lane.b32.xlu1 %v849_v51, %s2211_s0  ;;  %v846_v53 = vadd.f32 0.5, %v845_v52 }
 0xb5f   :  { %v847_v56 = vmul.f32 %v846_v53, %v666_v20 }
 0xbcf   :  { %v851_v54 = vpop.permute.xlu1 %850 }
 0xbd0   :  { %v853_v55 = vmul.f32 %v851_v54, %v846_v53 }
 0xbd2   :  { %855 = vrot.lane.b32.xlu0 %v853_v55, %s2216_s2 }
 0xc44   :  { %v856_v57 = vpop.permute.xlu0 %855 }
 0xc45   :  { %v858_v58 = vadd.f32 %v856_v57, %v847_v56 }
 0xc47   :  { %2139 = vtanh.f32 %v858_v58 }
 0xc51   :  { %v2140_v59 = vpop.eup %2139 }
 0xc52   :  { %861 = vrot.lane.b32.xlu1 %v2140_v59, %s2211_s0 }
 0xcc4   :  { %v862_v60 = vpop.permute.xlu1 %861 }
 0xcc5   :  { %v864_v61 = vmul.f32 %v862_v60, %v846_v53 }
 0xcc7   :  { %v943_v62 = vrot.slane %v864_v61, 1  ;;  %866 = vrot.lane.b32.xlu0 %v864_v61, %s2216_s2 }
 0xcc9   :  { %944 = vrot.lane.b32.xlu1 %v943_v62, %s2216_s2 }
 0xd39   :  { %v867_v63 = vpop.permute.xlu0 %866 }
 0xd3a   :  { %869 = vst.msk [vmem:[#allocation2 + $0x2] sm:$0x2] %vm292_vm4, %v867_v63  ;;  %1815 = vmatmul.mubr.msk.f32.vlgmr.msra.gmra.mrb[8].mxu0 %vm92_vm2, %v867_v63 }
 0xd3b   :  { %v945_v0 = vpop.permute.xlu1 %944  ;;  %2058 = vmatpush1.bf16.msra.mxu0 %v2275_v30  ;;  %1128 = vmatprep.mubr.f32.mxu0 %v2213_v29 }
 0xd3c   :  { %1928 = vmatmul.mubr.msk.f32.vlgmr.msra.gmra.mrb[8].mxu1 %vm92_vm2, %v945_v0  ;;  %2060 = vmatprep.subr.bf16.mxu0 %v2280_v36 }
 0xd3d   :  { %2065 = vmatpush3.bf16.msra.mxu1 %v2277_v31  ;;  %1938 = vmatprep.mubr.msk.f32.mxu1 %vm2215_vm1, %v2213_v29 }
 0xd3e   :  { %2066 = vmatprep.subr.bf16.mxu1 %v2212_v26 }
 0xd3f   :  { %2062 = vmatpush1.bf16.msra.mxu0 %v2283_v40 }
 0xd40   :  { %2070 = vmatprep.subr.bf16.mxu0 %v2271_v24 }
 0xd41   :  { %2068 = vmatpush3.bf16.msra.mxu1 %v2287_v41 }
 0xd42   :  { %2077 = vmatprep.subr.bf16.mxu1 %v2212_v26 }
 0xe0d   :  { %v938_v1 = vpop.f32.mrb[8].mxu0 }
 0xe0e   :  { %v1019_v4 = vrot.slane %v938_v1, 3  ;;  %v940_v6 = vpop.f32.mrb[9].mxu0 }
 0xe0f   :  { %v1014_v7 = vpop.f32.mrb[8].mxu1 }
 0xe10   :  { %v1021_v8 = vadd.f32 %v1019_v4, %v2265_v11  ;;  %v1022_v9 = vadd.f32 %v1014_v7, %v940_v6  ;;  %v1929_v10 = vpop.f32.mrb[9].mxu1 }
 0xe12   :  { %v1023_v12 = vadd.f32 %v1022_v9, %v2315_v50  ;;  %v1025_v13 = vrot.slane %v1021_v8, 5 }
 0xe14   :  { %v1028_v14 = vrot.slane %v1023_v12, 7 }
 0xe16   :  { %v1030_v15 = vsel %vm70_vm0, %v1025_v13, %v1028_v14 }
 0xe17   :  { %v1031_v16 = vmul.f32 0.5, %v1030_v15  ;;  %v1033_v17 = vrot.slane %v1030_v15, 6 }
 0xe19   :  { %v1035_v18 = vsel %vm261_vm3, %v1031_v16, %v1033_v17 }
 0xe1a   :  { %2141 = vtanh.f32 %v1035_v18 }
 0xe24   :  { %v2142_v19 = vpop.eup %2141 }
 0xe25   :  { %v1041_v20 = vrot.slane %v2142_v19, 2  ;;  %v1037_v21 = vmul.f32 0.5, %v2142_v19 }
 0xe27   :  { %1042 = vrot.lane.b32.xlu0 %v1041_v20, %s2211_s0  ;;  %v1038_v22 = vadd.f32 0.5, %v1037_v21 }
 0xe29   :  { %v1039_v27 = vmul.f32 %v1038_v22, %v858_v58 }
 0xe99   :  { %v1043_v23 = vpop.permute.xlu0 %1042 }
 0xe9a   :  { %v1045_v25 = vmul.f32 %v1043_v23, %v1038_v22 }
 0xe9c   :  { %1047 = vrot.lane.b32.xlu1 %v1045_v25, %s2216_s2 }
 0xf0e   :  { %v1048_v28 = vpop.permute.xlu1 %1047 }
 0xf0f   :  { %v1050_v32 = vadd.f32 %v1048_v28, %v1039_v27 }
 0xf11   :  { %2143 = vtanh.f32 %v1050_v32 }
 0xf1b   :  { %v2144_v33 = vpop.eup %2143 }
 0xf1c   :  { %1053 = vrot.lane.b32.xlu0 %v2144_v33, %s2211_s0 }
 0xf8e   :  { %v1054_v34 = vpop.permute.xlu0 %1053 }
 0xf8f   :  { %v1056_v35 = vmul.f32 %v1054_v34, %v1038_v22 }
 0xf91   :  { %v1135_v37 = vrot.slane %v1056_v35, 1  ;;  %1058 = vrot.lane.b32.xlu1 %v1056_v35, %s2216_s2 }
 0xf93   :  { %1136 = vrot.lane.b32.xlu0 %v1135_v37, %s2216_s2 }
0x1003   :  { %v1059_v38 = vpop.permute.xlu1 %1058 }
0x1004   :  { %1061 = vst.msk [vmem:[#allocation2 + $0x3] sm:$0x2] %vm292_vm4, %v1059_v38  ;;  %1817 = vmatmul.mubr.msk.f32.vlgmr.msra.gmra.mrb[10].mxu0 %vm92_vm2, %v1059_v38 }
0x1005   :  { %v1137_v39 = vpop.permute.xlu0 %1136  ;;  %2072 = vmatpush1.bf16.msra.mxu0 %v2275_v30  ;;  %1320 = vmatprep.mubr.f32.mxu0 %v2213_v29 }
0x1006   :  { %1939 = vmatmul.mubr.msk.f32.vlgmr.msra.gmra.mrb[10].mxu1 %vm92_vm2, %v1137_v39  ;;  %2074 = vmatprep.subr.bf16.mxu0 %v2280_v36 }
0x1007   :  { %2079 = vmatpush3.bf16.msra.mxu1 %v2277_v31  ;;  %1949 = vmatprep.mubr.msk.f32.mxu1 %vm2215_vm1, %v2213_v29 }
0x1008   :  { %2080 = vmatprep.subr.bf16.mxu1 %v2212_v26 }
0x1009   :  { %2076 = vmatpush1.bf16.msra.mxu0 %v2283_v40 }
0x100a   :  { %2084 = vmatprep.subr.bf16.mxu0 %v2271_v24 }
0x100b   :  { %2082 = vmatpush3.bf16.msra.mxu1 %v2287_v41 }
0x100c   :  { %2091 = vmatprep.subr.bf16.mxu1 %v2212_v26 }
0x10d7   :  { %v1130_v42 = vpop.f32.mrb[10].mxu0 }
0x10d8   :  { %v1211_v43 = vrot.slane %v1130_v42, 2  ;;  %v1132_v44 = vpop.f32.mrb[11].mxu0 }
0x10d9   :  { %v1206_v45 = vpop.f32.mrb[10].mxu1 }
0x10da   :  { %v1213_v46 = vadd.f32 %v1211_v43, %v2265_v11  ;;  %v1214_v47 = vadd.f32 %v1206_v45, %v1132_v44  ;;  %v1940_v48 = vpop.f32.mrb[11].mxu1 }
0x10dc   :  { %v1215_v49 = vadd.f32 %v1214_v47, %v2315_v50  ;;  %v1217_v51 = vrot.slane %v1213_v46, 6 }
0x10de   :  { %v1220_v52 = vrot.slane %v1215_v49, 7 }
0x10e0   :  { %v1222_v53 = vsel %vm70_vm0, %v1217_v51, %v1220_v52 }
0x10e1   :  { %v1223_v54 = vmul.f32 0.5, %v1222_v53  ;;  %v1225_v24 = vrot.slane %v1222_v53, 6 }
0x10e3   :  { %v1227_v55 = vsel %vm261_vm3, %v1223_v54, %v1225_v24 }
0x10e4   :  { %2145 = vtanh.f32 %v1227_v55 }
0x10ee   :  { %v2146_v56 = vpop.eup %2145 }
0x10ef   :  { %v1233_v57 = vrot.slane %v2146_v56, 2  ;;  %v1229_v58 = vmul.f32 0.5, %v2146_v56 }
0x10f1   :  { %1234 = vrot.lane.b32.xlu1 %v1233_v57, %s2211_s0  ;;  %v1230_v59 = vadd.f32 0.5, %v1229_v58 }
0x10f3   :  { %v1231_v62 = vmul.f32 %v1230_v59, %v1050_v32 }
0x1163   :  { %v1235_v60 = vpop.permute.xlu1 %1234 }
0x1164   :  { %v1237_v61 = vmul.f32 %v1235_v60, %v1230_v59  ;;  %v42_v60 = vld [vmem:[#allocation3 + $0x80] sm:$0xff] }
0x1166   :  { %1239 = vrot.lane.b32.xlu0 %v1237_v61, %s2216_s2  ;;  %v43_v61 = vld [vmem:[#allocation3 + $0x90] sm:$0xff] }
0x11d8   :  { %v1240_v63 = vpop.permute.xlu0 %1239 }
0x11d9   :  { %v1242_v0 = vadd.f32 %v1240_v63, %v1231_v62  ;;  %v2098_v62 = vpack.c.bf16 %v43_v61, %v42_v60  ;;  %v44_v63 = vld [vmem:[#allocation3 + $0xa0] sm:$0xff] }
0x11db   :  { %2147 = vtanh.f32 %v1242_v0 }
0x11e5   :  { %v2148_v1 = vpop.eup %2147 }
0x11e6   :  { %1245 = vrot.lane.b32.xlu1 %v2148_v1, %s2211_s0 }
0x1258   :  { %v1246_v4 = vpop.permute.xlu1 %1245 }
0x1259   :  { %v1248_v6 = vmul.f32 %v1246_v4, %v1230_v59  ;;  %v46_v4 = vld [vmem:[#allocation3 + $0x88] sm:$0xff] }
0x125b   :  { %v1327_v7 = vrot.slane %v1248_v6, 1  ;;  %1250 = vrot.lane.b32.xlu0 %v1248_v6, %s2216_s2  ;;  %v47_v6 = vld [vmem:[#allocation3 + $0x98] sm:$0xff] }
0x125d   :  { %1328 = vrot.lane.b32.xlu1 %v1327_v7, %s2216_s2  ;;  %v2104_v7 = vpack.c.bf16 %v47_v6, %v46_v4 }
0x12cd   :  { %v1251_v8 = vpop.permute.xlu0 %1250 }
0x12ce   :  { %1253 = vst.msk [vmem:[#allocation2 + $0x4] sm:$0x2] %vm292_vm4, %v1251_v8  ;;  %1819 = vmatmul.mubr.msk.f32.vlgmr.msra.gmra.mrb[12].mxu0 %vm92_vm2, %v1251_v8 }
0x12cf   :  { %v1329_v9 = vpop.permute.xlu1 %1328  ;;  %2086 = vmatpush1.bf16.msra.mxu0 %v2275_v30  ;;  %1512 = vmatprep.mubr.f32.mxu0 %v2213_v29 }
0x12d0   :  { %1950 = vmatmul.mubr.msk.f32.vlgmr.msra.gmra.mrb[12].mxu1 %vm92_vm2, %v1329_v9  ;;  %2088 = vmatprep.subr.bf16.mxu0 %v2280_v36 }
0x12d1   :  { %2093 = vmatpush3.bf16.msra.mxu1 %v2277_v31  ;;  %1960 = vmatprep.mubr.msk.f32.mxu1 %vm2215_vm1, %v2213_v29 }
0x12d2   :  { %2094 = vmatprep.subr.bf16.mxu1 %v2212_v26 }
0x12d3   :  { %2090 = vmatpush1.bf16.msra.mxu0 %v2283_v40 }
0x12d4   :  { %2097 = vmatprep.subr.bf16.mxu0 %v2212_v26 }
0x12d5   :  { %2096 = vmatpush3.bf16.msra.mxu1 %v2287_v41 }
0x12d6   :  { %2103 = vmatprep.subr.bf16.mxu1 %v2212_v26 }
0x13a1   :  { %v1322_v30 = vpop.f32.mrb[12].mxu0 }
0x13a2   :  { %v1403_v10 = vrot.slane %v1322_v30, 1  ;;  %v1324_v12 = vpop.f32.mrb[13].mxu0 }
0x13a3   :  { %v1398_v13 = vpop.f32.mrb[12].mxu1 }
0x13a4   :  { %v1405_v36 = vadd.f32 %v1403_v10, %v2265_v11  ;;  %v1406_v31 = vadd.f32 %v1398_v13, %v1324_v12  ;;  %v1951_v14 = vpop.f32.mrb[13].mxu1  ;;  %v48_v12 = vld [vmem:[#allocation3 + $0xa8] sm:$0xff]  ;;  %v49_v13 = vld [vmem:[#allocation3 + $0xb8] sm:$0xff] }
0x13a6   :  { %v1407_v15 = vadd.f32 %v1406_v31, %v2315_v50  ;;  %v1409_v16 = vrot.slane %v1405_v36, 7  ;;  %v2107_v36 = vpack.c.bf16 %v49_v13, %v48_v12  ;;  %v1633_v31 = vsub.s32 3, %v2254_v3 }
0x13a8   :  { %v1412_v17 = vrot.slane %v1407_v15, 7  ;;  %v1634_v14 = vrot.slane %v2260_v5, %v1633_v31 }
0x13aa   :  { %v1414_v40 = vsel %vm70_vm0, %v1409_v16, %v1412_v17 }
0x13ab   :  { %v1415_v18 = vmul.f32 0.5, %v1414_v40  ;;  %v1417_v19 = vrot.slane %v1414_v40, 6  ;;  %v1711_v40 = vsub.s32 4, %v2254_v3 }
0x13ad   :  { %v1419_v41 = vsel %vm261_vm3, %v1415_v18, %v1417_v19  ;;  %v1712_v18 = vrot.slane %v2260_v5, %v1711_v40 }
0x13ae   :  { %2149 = vtanh.f32 %v1419_v41 }
0x13b8   :  { %v2150_v20 = vpop.eup %2149 }
0x13b9   :  { %v1425_v21 = vrot.slane %v2150_v20, 2  ;;  %v1421_v22 = vmul.f32 0.5, %v2150_v20 }
0x13bb   :  { %1426 = vrot.lane.b32.xlu0 %v1425_v21, %s2211_s0  ;;  %v1422_v23 = vadd.f32 0.5, %v1421_v22  ;;  %v1787_v21 = vand.u32 127, %v56_v2 }
0x13bd   :  { %v1423_v27 = vmul.f32 %v1422_v23, %v1242_v0  ;;  %v45_v0 = vld [vmem:[#allocation3 + $0xb0] sm:$0xff]  ;;  %vm1788_vm6 = vcmp.eq.s32.totalorder %v1787_v21, 0 }
0x13be   :  { %v2101_v1 = vpack.c.bf16 %v45_v0, %v44_v63 }
0x142d   :  { %v1427_v11 = vpop.permute.xlu0 %1426 }
0x142e   :  { %v1429_v25 = vmul.f32 %v1427_v11, %v1422_v23 }
0x1430   :  { %1431 = vrot.lane.b32.xlu1 %v1429_v25, %s2216_s2 }
0x14a2   :  { %v1432_v28 = vpop.permute.xlu1 %1431 }
0x14a3   :  { %v1434_v32 = vadd.f32 %v1432_v28, %v1423_v27 }
0x14a5   :  { %2151 = vtanh.f32 %v1434_v32  ;;  %v1604_v56 = vrot.slane %v1434_v32, 1 }
0x14af   :  { %v2152_v33 = vpop.eup %2151 }
0x14b0   :  { %1437 = vrot.lane.b32.xlu0 %v2152_v33, %s2211_s0 }
0x1522   :  { %v1438_v34 = vpop.permute.xlu0 %1437 }
0x1523   :  { %v1440_v35 = vmul.f32 %v1438_v34, %v1422_v23 }
0x1525   :  { %v1518_v37 = vrot.slane %v1440_v35, 1  ;;  %1442 = vrot.lane.b32.xlu1 %v1440_v35, %s2216_s2 }
0x1527   :  { %1519 = vrot.lane.b32.xlu0 %v1518_v37, %s2216_s2 }
0x1597   :  { %v1443_v38 = vpop.permute.xlu1 %1442 }
0x1598   :  { %1445 = vst.msk [vmem:[#allocation2 + $0x5] sm:$0x2] %vm292_vm4, %v1443_v38  ;;  %1821 = vmatmul.mubr.msk.f32.vlgmr.msra.gmra.mrb[14].mxu0 %vm92_vm2, %v1443_v38 }
0x1599   :  { %v1520_v39 = vpop.permute.xlu0 %1519  ;;  %1971 = vmatprep.mubr.msk.f32.mxu0 %vm2215_vm1, %v2213_v29  ;;  %2099 = vmatpush3.bf16.msra.mxu0 %v2098_v62 }
0x159a   :  { %1961 = vmatmul.mubr.msk.f32.vlgmr.msra.gmra.mrb[14].mxu1 %vm92_vm2, %v1520_v39  ;;  %2100 = vmatprep.subr.bf16.mxu0 %v2212_v26 }
0x159b   :  { %1982 = vmatprep.mubr.msk.f32.mxu1 %vm2215_vm1, %v2213_v29  ;;  %2105 = vmatpush3.bf16.msra.mxu1 %v2104_v7 }
0x159c   :  { %2106 = vmatprep.subr.bf16.mxu1 %v2212_v26 }
0x159d   :  { %2102 = vmatpush3.bf16.msra.mxu0 %v2101_v1 }
0x159f   :  { %2108 = vmatpush3.bf16.msra.mxu1 %v2107_v36 }
0x166b   :  { %v1514_v42 = vpop.f32.mrb[14].mxu0 }
0x166c   :  { %v1515_v43 = vpop.f32.mrb[15].mxu0 }
0x166d   :  { %v1589_v44 = vpop.f32.mrb[14].mxu1 }
0x166e   :  { %v1593_v45 = vadd.f32 %v1589_v44, %v1515_v43  ;;  %v1962_v46 = vpop.f32.mrb[15].mxu1 }
0x1670   :  { %v1594_v47 = vadd.f32 %v1593_v45, %v2315_v50 }
0x1672   :  { %v1595_v48 = vmul.f32 0.5, %v1594_v47  ;;  %v1597_v49 = vrot.slane %v1594_v47, 7 }
0x1674   :  { %v1599_v51 = vsel %vm70_vm0, %v1595_v48, %v1597_v49 }
0x1675   :  { %2153 = vtanh.f32 %v1599_v51 }
0x167f   :  { %v2154_v52 = vpop.eup %2153 }
0x1680   :  { %v1608_v53 = vrot.slane %v2154_v52, 1  ;;  %v1601_v54 = vmul.f32 0.5, %v2154_v52 }
0x1682   :  { %1609 = vrot.lane.b32.xlu1 %v1608_v53, %s2211_s0  ;;  %v1602_v24 = vadd.f32 0.5, %v1601_v54 }
0x1684   :  { %v1606_v57 = vmul.f32 %v1604_v56, %v1602_v24 }
0x16f4   :  { %v1610_v55 = vpop.permute.xlu1 %1609 }
0x16f5   :  { %v1612_v29 = vmul.f32 %v1610_v55, %v1602_v24 }
0x16f7   :  { %1614 = vrot.lane.b32.xlu0 %v1612_v29, %s2216_s2 }
0x1769   :  { %v1615_v58 = vpop.permute.xlu0 %1614 }
0x176a   :  { %v1617_v59 = vadd.f32 %v1615_v58, %v1606_v57 }
0x176c   :  { %2155 = vtanh.f32 %v1617_v59 }
0x1776   :  { %v2156_v50 = vpop.eup %2155 }
0x1777   :  { %1620 = vrot.lane.b32.xlu1 %v2156_v50, %s2211_s0 }
0x17e9   :  { %v1621_v8 = vpop.permute.xlu1 %1620 }
0x17ea   :  { %v1623_v9 = vmul.f32 %v1621_v8, %v1602_v24 }
0x17ec   :  { %1625 = vrot.lane.b32.xlu0 %v1623_v9, %s2216_s2 }
0x185e   :  { %v1626_v30 = vpop.permute.xlu0 %1625 }
0x185f   :  { %1629 = vst.msk [vmem:[#allocation2 + $0x7] sm:$0x1] %vm1628_vm5, %v1626_v30 }
0x1866   :  { %v1630_v10 = vld [vmem:[#allocation2] sm:$0xff] }
0x1867   :  { %1972 = vmatmul.mubr.msk.f32.vlgmr.msra.gmra.mrb[16].mxu0 %vm92_vm2, %v1630_v10 }
0x193a   :  { %v1704_v15 = vpop.f32.mrb[16].mxu0 }
0x193b   :  { %v1705_v16 = vadd.f32 %v1704_v15, %v1634_v14  ;;  %v1973_v17 = vpop.f32.mrb[17].mxu0 }
0x193d   :  { %v1708_v26 = vmax.f32 %v1705_v16, 0.0 }
0x193f   :  { %1983 = vmatmul.mubr.msk.f32.vlgmr.msra.gmra.mrb[16].mxu1 %vm92_vm2, %v1708_v26 }
0x1a12   :  { %v1782_v19 = vpop.f32.mrb[16].mxu1 }
0x1a13   :  { %v1783_v41 = vadd.f32 %v1782_v19, %v1712_v18  ;;  %v1984_v20 = vpop.f32.mrb[17].mxu1 }
0x1a15   :  { %2157 = vtanh.f32 %v1783_v41 }
0x1a1f   :  { %v2158_v22 = vpop.eup %2157 }
0x1a20   :  { %v1790_v23 = vsel %vm1788_vm6, %v2158_v22, %v1783_v41 }
0x1a21   :  { %1791 = vst [vmem:[#allocation6] sm:$0xff] %v1790_v23 }
0x1a22   :  { %2192 = shalt.err (!%p2189_p12)
}
0x1a23   :  { %s2193_s8 = scalar_lea.hbm %s2501_s3, 128 }
0x1a24   :  { %p2194_p13 = scmp.ne.s32.totalorder %s2501_s3, %s2193_s8  ;;  %p2197_p0 = scmp.lt.u32.totalorder %s2193_s8, %s2501_s3 }
0x1a26   :  { %p2199_p1 = pnand %p2197_p0, %p2194_p13 }
0x1a28   :  { %2202 = shalt.err (!%p2199_p1)
}
0x1a29   :  { %1801 = dma.vmem_to_hbm [thread:$0]  %s1799_s4, 128, %s2501_s3, [#allocation5]  }
0x1a2a   :  { %2205 = dma.done.wait [#allocation5], 128  }
0x1a2b   :  { %2206 = vsyncadd [#allocation5], 4294967168 }
0x1a2c   :  { %1805 = vsyncpa [#allocation4], 1 }
0x1a2d   :  { %1806 = vsyncpa [#allocation5], 1 }

</bundles_post_ra>
